<compile_context>
chip_gen: v5e
topology: v5e:2x2
jax: 0.10.0
libtpu: 0.0.40
codegen_flags: <defaults>
</compile_context>

<pallas_src>
import jax
import jax.numpy as jnp
import numpy as np
from jax import lax
from jax.experimental import pallas as pl
from jax.experimental.pallas import tpu as pltpu

_FULL_UNROLL_MAX_S = 64   # fully unroll the time recurrences at or below this length


def _viterbi_kernel(feats_ref, last_pos_ref, trans_t_ref, trans_stop_ref,
                    decode_ref, bp_ref):
    # feats_ref     : (S, T, TB) emission scores, time-major, batch-on-lanes
    # last_pos_ref  : (1, TB) i32 index of last valid step per sequence (= sum(mask)-1)
    # trans_t_ref   : (T, T) f32  transposed transitions: trans_t[j, i] = trans[i, j]
    # trans_stop_ref: (T, 1) f32  trans[:, STOP]
    # decode_ref    : (S, TB) i32 decoded tag ids (time-major output block)
    # bp_ref        : (S, T, TB) i32 scratch back-pointers (time-major, lane-dense)
    S, T, TB = feats_ref.shape
    START = T - 2   # START_TAG = -2
    # STOP = T - 1  (handled via trans_stop_ref)

    trans_t = trans_t_ref[...].astype(jnp.float32)        # (T_to, T_from)
    trans_stop = trans_stop_ref[...].astype(jnp.float32)  # (T, 1)
    last_pos = last_pos_ref[...]                           # (1, TB) i32

    # Hoisted loop-invariant values (JAX does not CSE broadcast_in_dim).
    # trans_cols[i][j, b] = trans[i, j], broadcast over the lane (batch) axis.
    trans_cols = [jnp.broadcast_to(trans_t[:, i:i + 1], (T, TB)) for i in range(T)]
    tag_col = lax.broadcasted_iota(jnp.int32, (T, TB), 0)
    bp_zero = jnp.zeros((T, TB), jnp.int32)

    # t = 0: partition[j, b] = feats[b, 0, j] + trans[START, j]
    partition = feats_ref[0].astype(jnp.float32) + trans_cols[START]   # (T, TB)
    last_part = partition                                  # partition at last_pos

    def fwd_step(t, feat_t, partition, last_part):
        # Running max/argmax over previous tag i (VPU only, first-max tie break):
        #   best[j, b] = max_i (trans[i, j] + partition[i, b])
        best = trans_cols[0] + partition[0:1, :]           # (T, TB)
        bp = bp_zero
        for i in range(1, T):
            cand = trans_cols[i] + partition[i:i + 1, :]
            better = cand > best
            best = jnp.where(better, cand, best)
            bp = jnp.where(better, jnp.int32(i), bp)
        new_partition = best + feat_t                      # emission added post-max
        # cur_bp.masked_fill_(mask[t] == 0, 0); prefix mask: mask[t]==0 <=> t > last_pos
        bp = jnp.where(t > last_pos, 0, bp)
        bp_ref[pl.ds(t - 1, 1)] = bp[None]                 # lane-dense (1, T, TB) store
        # track partition at the last valid position of each sequence
        new_last = jnp.where(last_pos == t, new_partition, last_part)
        return new_partition, new_last

    if S <= _FULL_UNROLL_MAX_S:
        for t in range(1, S):                              # static slices, full unroll
            feat_t = feats_ref[t].astype(jnp.float32)      # (T, TB)
            partition, last_part = fwd_step(t, feat_t, partition, last_part)
    else:
        def fwd_body(t, carry):
            feat_t = feats_ref[pl.ds(t, 1)][0].astype(jnp.float32)
            return fwd_step(t, feat_t, *carry)
        partition, last_part = lax.fori_loop(1, S, fwd_body, (partition, last_part),
                                             unroll=4)

    # appended pad_zero row (torch appends a zero back-pointer row)
    bp_ref[pl.ds(S - 1, 1)] = jnp.zeros((1, T, TB), jnp.int32)

    # Transition into STOP: pointer0[b] = argmax_i (last_part[i, b] + trans[i, STOP])
    stop_scores = last_part + trans_stop                   # (T, TB)
    max_stop = jnp.max(stop_scores, axis=0, keepdims=True) # (1, TB)
    pointer0 = jnp.min(jnp.where(stop_scores == max_stop, tag_col, T),
                       axis=0, keepdims=True)              # (1, TB) first-max index

    # decode is written one lane-dense (1, TB) row per step (time-major output block).
    decode_ref[pl.ds(S - 1, 1)] = pointer0

    def bwd_step(idx, pointer):
        bp_row = bp_ref[pl.ds(idx, 1)][0]                  # (T, TB) lane-dense load
        # back_points.scatter_(1, last_position, insert_last)
        bp_row = jnp.where(last_pos == idx, pointer0, bp_row)
        # pointer[b] = bp_row[pointer[b], b]  -- T-step select chain (VPU only)
        new_pointer = bp_row[0:1, :]
        for i in range(1, T):
            new_pointer = jnp.where(pointer == i, bp_row[i:i + 1, :], new_pointer)
        decode_ref[pl.ds(idx, 1)] = new_pointer
        return new_pointer

    if S <= _FULL_UNROLL_MAX_S:
        pointer = pointer0
        for idx in range(S - 2, -1, -1):
            pointer = bwd_step(idx, pointer)
    else:
        def bwd_body(k, pointer):
            return bwd_step(S - 2 - k, pointer)
        lax.fori_loop(0, S - 1, bwd_body, pointer0, unroll=8)


def crf_viterbi_decode(feats, mask, transitions):
    """feats: (B, S, T), mask: (B, S) 0/1 prefix mask, transitions: (T, T).
    Returns decode_idx: (B, S) int32."""
    B, S, T = feats.shape
    # Prefix-mask contract: mask[b] = 1...1 0...0 ; last valid index = sum(mask) - 1.
    # (length >= 1 is assumed, as in the torch length-based gather.)
    lengths = jnp.sum(mask.astype(jnp.int32), axis=1)                  # (B,)

    TB = 128                                      # batch tile = one full lane width
    Bp = ((B + TB - 1) // TB) * TB
    # Time-major, batch-on-lanes layout; pad batch up to a lane multiple.
    feats_tm = jnp.transpose(feats, (1, 2, 0))                         # (S, T, B)
    if Bp != B:
        feats_tm = jnp.pad(feats_tm, ((0, 0), (0, 0), (0, Bp - B)))
        lengths = jnp.pad(lengths, (0, Bp - B), constant_values=1)
    last_pos = (lengths - 1).reshape(1, Bp).astype(jnp.int32)          # (1, Bp)

    trans_f32 = transitions.astype(jnp.float32)
    trans_t = trans_f32.T                                              # (T_to, T_from)
    trans_stop = trans_f32[:, T - 1:T]                                 # (T, 1) = trans[:, STOP]

    # VMEM budget: double-buffered feats block + bp scratch + double-buffered decode.
    itemsize = jnp.dtype(feats.dtype).itemsize
    need = (2 * S * T * TB * itemsize
            + S * T * TB * 4
            + 2 * S * TB * 4
            + 2 * (T * T + T + TB) * 4)
    vmem_limit = int(min(96 * 1024 * 1024, max(32 * 1024 * 1024, 2 * need)))

    grid = (Bp // TB,)
    decode_tm = pl.pallas_call(
        _viterbi_kernel,
        out_shape=jax.ShapeDtypeStruct((S, Bp), jnp.int32),
        grid_spec=pltpu.PrefetchScalarGridSpec(
            num_scalar_prefetch=0,
            grid=grid,
            in_specs=[
                pl.BlockSpec((S, T, TB), lambda b: (0, 0, b)),   # feats (time-major)
                pl.BlockSpec((1, TB), lambda b: (0, b)),         # last_pos
                pl.BlockSpec((T, T), lambda b: (0, 0)),          # transitions.T
                pl.BlockSpec((T, 1), lambda b: (0, 0)),          # trans[:, STOP]
            ],
            out_specs=pl.BlockSpec((S, TB), lambda b: (0, b)),   # lane-dense decode
            scratch_shapes=[pltpu.VMEM((S, T, TB), jnp.int32)],  # back-pointers
        ),
        compiler_params=pltpu.CompilerParams(
            dimension_semantics=("parallel",),                   # batch tiles independent
            vmem_limit_bytes=vmem_limit,
        ),
    )(feats_tm, last_pos, trans_t, trans_stop)

    return jnp.transpose(decode_tm[:, :B], (1, 0))               # (B, S)


def crf_forward(feats, mask, transitions):
    """Mirrors CRF.forward: returns (path_score=None, best_path)."""
    # TODO(synk): torch returns int64 decode indices; the TPU kernel emits int32.
    return None, crf_viterbi_decode(feats, mask, transitions)


def _viterbi_ref(feats, mask, trans):
    """Plain numpy transcription of CRF._viterbi_decode for verification."""
    B, S, T = feats.shape
    START, STOP = T - 2, T - 1
    length = mask.sum(axis=1)
    partition = feats[:, 0, :] + trans[START, :]
    part_hist = [partition.copy()]
    back_points = []
    for t in range(1, S):
        cur = feats[:, t, :][:, None, :] + trans[None, :, :] + partition[:, :, None]
        partition = cur.max(axis=1)
        bp = cur.argmax(axis=1)
        bp = np.where(mask[:, t:t + 1] == 0, 0, bp)
        part_hist.append(partition.copy())
        back_points.append(bp)
    back_points.append(np.zeros((B, T), dtype=np.int64))
    part_hist = np.stack(part_hist, axis=0)
    last_part = part_hist[length - 1, np.arange(B), :]
    last_values = last_part[:, :, None] + trans[None, :, :]
    last_bp = last_values.argmax(axis=1)
    pointer = last_bp[:, STOP]
    bps = np.stack(back_points, axis=0)
    for b in range(B):
        bps[length[b] - 1, b, :] = pointer[b]
    decode = np.zeros((S, B), dtype=np.int64)
    decode[S - 1] = pointer
    for idx in range(S - 2, -1, -1):
        pointer = bps[idx, np.arange(B), pointer]
        decode[idx] = pointer
    return decode.T


if __name__ == "__main__":
    key = jax.random.PRNGKey(0)
    tagset_size = 4
    T = tagset_size + 2        # tag_size = tagset_size + 2 (START/STOP)
    B, S = 2, 8
    k1, k2 = jax.random.split(key, 2)

    feats = jax.random.normal(k1, (B, S, T), dtype=jnp.float32)
    # deterministic transitions parameter (same shape as nn.Parameter in __init__)
    transitions = 0.1 * jax.random.normal(k2, (T, T), dtype=jnp.float32)
    # variable-length prefix mask: seq 0 full length, seq 1 length 5
    lengths = jnp.array([S, 5])
    mask = (jnp.arange(S)[None, :] < lengths[:, None]).astype(jnp.int32)

    path_score, decode = crf_forward(feats, mask, transitions)
    decode = jax.block_until_ready(decode)

    ref = _viterbi_ref(np.asarray(feats), np.asarray(mask), np.asarray(transitions))
    assert path_score is None
    assert np.array_equal(np.asarray(decode), ref.astype(np.int32)), (decode, ref)
    print("KERNEL_OK")
</pallas_src>

<mosaic_0001>
module attributes {stable_mosaic.version = 11 : i64} {
  func.func @_viterbi_kernel(%arg0: i32, %arg1: memref<8x6x128xf32, #tpu.memory_space<vmem>>, %arg2: memref<1x128xi32, #tpu.memory_space<vmem>>, %arg3: memref<6x6xf32, #tpu.memory_space<vmem>>, %arg4: memref<6x1xf32, #tpu.memory_space<vmem>>, %arg5: memref<8x128xi32, #tpu.memory_space<vmem>>, %arg6: memref<8x6x128xi32, #tpu.memory_space<vmem>>) attributes {dimension_semantics = [#tpu.dimension_semantics<parallel>], iteration_bounds = array<i64: 1>, scalar_prefetch = 0 : i64, scratch_operands = 1 : i64, tpu.core_type = #tpu.core_type<tc>, window_params = [{transform_indices = @transform_0, window_bounds = array<i64: 8, 6, 128>}, {transform_indices = @transform_1, window_bounds = array<i64: 1, 128>}, {pipeline_mode = #tpu.pipeline_mode<synchronous>, transform_indices = @transform_2, window_bounds = array<i64: 6, 6>}, {pipeline_mode = #tpu.pipeline_mode<synchronous>, transform_indices = @transform_3, window_bounds = array<i64: 6, 1>}, {transform_indices = @transform_4, window_bounds = array<i64: 8, 128>}]} {
    %c0 = arith.constant 0 : index
    %c0_0 = arith.constant 0 : index
    %0 = vector.load %arg3[%c0, %c0_0] : memref<6x6xf32, #tpu.memory_space<vmem>>, vector<6x6xf32>
    %c0_1 = arith.constant 0 : index
    %c0_2 = arith.constant 0 : index
    %1 = vector.load %arg4[%c0_1, %c0_2] : memref<6x1xf32, #tpu.memory_space<vmem>>, vector<6x1xf32>
    %c0_3 = arith.constant 0 : index
    %c0_4 = arith.constant 0 : index
    %2 = vector.load %arg2[%c0_3, %c0_4] : memref<1x128xi32, #tpu.memory_space<vmem>>, vector<1x128xi32>
    %3 = vector.extract_strided_slice %0 {offsets = [0, 0], sizes = [6, 1], strides = [1, 1]} : vector<6x6xf32> to vector<6x1xf32>
    %4 = vector.shape_cast %3 : vector<6x1xf32> to vector<6x1xf32>
    %5 = vector.broadcast %4 : vector<6x1xf32> to vector<6x128xf32>
    %6 = vector.extract_strided_slice %0 {offsets = [0, 1], sizes = [6, 1], strides = [1, 1]} : vector<6x6xf32> to vector<6x1xf32>
    %7 = vector.shape_cast %6 : vector<6x1xf32> to vector<6x1xf32>
    %8 = vector.broadcast %7 : vector<6x1xf32> to vector<6x128xf32>
    %9 = vector.extract_strided_slice %0 {offsets = [0, 2], sizes = [6, 1], strides = [1, 1]} : vector<6x6xf32> to vector<6x1xf32>
    %10 = vector.shape_cast %9 : vector<6x1xf32> to vector<6x1xf32>
    %11 = vector.broadcast %10 : vector<6x1xf32> to vector<6x128xf32>
    %12 = vector.extract_strided_slice %0 {offsets = [0, 3], sizes = [6, 1], strides = [1, 1]} : vector<6x6xf32> to vector<6x1xf32>
    %13 = vector.shape_cast %12 : vector<6x1xf32> to vector<6x1xf32>
    %14 = vector.broadcast %13 : vector<6x1xf32> to vector<6x128xf32>
    %15 = vector.extract_strided_slice %0 {offsets = [0, 4], sizes = [6, 1], strides = [1, 1]} : vector<6x6xf32> to vector<6x1xf32>
    %16 = vector.shape_cast %15 : vector<6x1xf32> to vector<6x1xf32>
    %17 = vector.broadcast %16 : vector<6x1xf32> to vector<6x128xf32>
    %18 = vector.extract_strided_slice %0 {offsets = [0, 5], sizes = [6, 1], strides = [1, 1]} : vector<6x6xf32> to vector<6x1xf32>
    %19 = vector.shape_cast %18 : vector<6x1xf32> to vector<6x1xf32>
    %20 = vector.broadcast %19 : vector<6x1xf32> to vector<6x128xf32>
    %21 = tpu.iota {dimensions = array<i32: 0>} : vector<6x128xi32>
    %c0_i32 = arith.constant 0 : i32
    %22 = vector.broadcast %c0_i32 : i32 to vector<6x128xi32>
    %c0_5 = arith.constant 0 : index
    %c0_6 = arith.constant 0 : index
    %c0_7 = arith.constant 0 : index
    %23 = vector.load %arg1[%c0_5, %c0_6, %c0_7] : memref<8x6x128xf32, #tpu.memory_space<vmem>>, vector<1x6x128xf32>
    %24 = vector.shape_cast %23 : vector<1x6x128xf32> to vector<6x128xf32>
    %25 = arith.addf %24, %17 : vector<6x128xf32>
    %c1 = arith.constant 1 : index
    %c0_8 = arith.constant 0 : index
    %c0_9 = arith.constant 0 : index
    %26 = vector.load %arg1[%c1, %c0_8, %c0_9] : memref<8x6x128xf32, #tpu.memory_space<vmem>>, vector<1x6x128xf32>
    %27 = vector.shape_cast %26 : vector<1x6x128xf32> to vector<6x128xf32>
    %28 = vector.extract_strided_slice %25 {offsets = [0, 0], sizes = [1, 128], strides = [1, 1]} : vector<6x128xf32> to vector<1x128xf32>
    %29 = vector.broadcast %28 : vector<1x128xf32> to vector<6x128xf32>
    %30 = arith.addf %5, %29 : vector<6x128xf32>
    %31 = vector.extract_strided_slice %25 {offsets = [1, 0], sizes = [1, 128], strides = [1, 1]} : vector<6x128xf32> to vector<1x128xf32>
    %32 = vector.broadcast %31 : vector<1x128xf32> to vector<6x128xf32>
    %33 = arith.addf %8, %32 : vector<6x128xf32>
    %34 = arith.cmpf ogt, %33, %30 : vector<6x128xf32>
    %35 = arith.select %34, %33, %30 : vector<6x128xi1>, vector<6x128xf32>
    %c1_i32 = arith.constant 1 : i32
    %36 = vector.broadcast %c1_i32 : i32 to vector<6x128xi32>
    %37 = arith.select %34, %36, %22 : vector<6x128xi1>, vector<6x128xi32>
    %38 = vector.extract_strided_slice %25 {offsets = [2, 0], sizes = [1, 128], strides = [1, 1]} : vector<6x128xf32> to vector<1x128xf32>
    %39 = vector.broadcast %38 : vector<1x128xf32> to vector<6x128xf32>
    %40 = arith.addf %11, %39 : vector<6x128xf32>
    %41 = arith.cmpf ogt, %40, %35 : vector<6x128xf32>
    %42 = arith.select %41, %40, %35 : vector<6x128xi1>, vector<6x128xf32>
    %c2_i32 = arith.constant 2 : i32
    %43 = vector.broadcast %c2_i32 : i32 to vector<6x128xi32>
    %44 = arith.select %41, %43, %37 : vector<6x128xi1>, vector<6x128xi32>
    %45 = vector.extract_strided_slice %25 {offsets = [3, 0], sizes = [1, 128], strides = [1, 1]} : vector<6x128xf32> to vector<1x128xf32>
    %46 = vector.broadcast %45 : vector<1x128xf32> to vector<6x128xf32>
    %47 = arith.addf %14, %46 : vector<6x128xf32>
    %48 = arith.cmpf ogt, %47, %42 : vector<6x128xf32>
    %49 = arith.select %48, %47, %42 : vector<6x128xi1>, vector<6x128xf32>
    %c3_i32 = arith.constant 3 : i32
    %50 = vector.broadcast %c3_i32 : i32 to vector<6x128xi32>
    %51 = arith.select %48, %50, %44 : vector<6x128xi1>, vector<6x128xi32>
    %52 = vector.extract_strided_slice %25 {offsets = [4, 0], sizes = [1, 128], strides = [1, 1]} : vector<6x128xf32> to vector<1x128xf32>
    %53 = vector.broadcast %52 : vector<1x128xf32> to vector<6x128xf32>
    %54 = arith.addf %17, %53 : vector<6x128xf32>
    %55 = arith.cmpf ogt, %54, %49 : vector<6x128xf32>
    %56 = arith.select %55, %54, %49 : vector<6x128xi1>, vector<6x128xf32>
    %c4_i32 = arith.constant 4 : i32
    %57 = vector.broadcast %c4_i32 : i32 to vector<6x128xi32>
    %58 = arith.select %55, %57, %51 : vector<6x128xi1>, vector<6x128xi32>
    %59 = vector.extract_strided_slice %25 {offsets = [5, 0], sizes = [1, 128], strides = [1, 1]} : vector<6x128xf32> to vector<1x128xf32>
    %60 = vector.broadcast %59 : vector<1x128xf32> to vector<6x128xf32>
    %61 = arith.addf %20, %60 : vector<6x128xf32>
    %62 = arith.cmpf ogt, %61, %56 : vector<6x128xf32>
    %63 = arith.select %62, %61, %56 : vector<6x128xi1>, vector<6x128xf32>
    %c5_i32 = arith.constant 5 : i32
    %64 = vector.broadcast %c5_i32 : i32 to vector<6x128xi32>
    %65 = arith.select %62, %64, %58 : vector<6x128xi1>, vector<6x128xi32>
    %66 = arith.addf %63, %27 : vector<6x128xf32>
    %c1_i32_10 = arith.constant 1 : i32
    %67 = vector.broadcast %c1_i32_10 : i32 to vector<1x128xi32>
    %68 = arith.cmpi slt, %2, %67 : vector<1x128xi32>
    %c0_i32_11 = arith.constant 0 : i32
    %69 = vector.shape_cast %68 : vector<1x128xi1> to vector<1x128xi1>
    %70 = vector.broadcast %69 : vector<1x128xi1> to vector<6x128xi1>
    %71 = vector.broadcast %c0_i32_11 : i32 to vector<6x128xi32>
    %72 = arith.select %70, %71, %65 : vector<6x128xi1>, vector<6x128xi32>
    %73 = vector.shape_cast %72 : vector<6x128xi32> to vector<1x6x128xi32>
    %c0_12 = arith.constant 0 : index
    %c0_13 = arith.constant 0 : index
    %c0_14 = arith.constant 0 : index
    %74 = vector.load %arg6[%c0_12, %c0_13, %c0_14] : memref<8x6x128xi32, #tpu.memory_space<vmem>>, vector<1x6x128xi32>
    tpu.vector_store %arg6[%c0_12, %c0_13, %c0_14], %73 {strides = array<i32>} : memref<8x6x128xi32, #tpu.memory_space<vmem>>, vector<1x6x128xi32>,
    %c1_i32_15 = arith.constant 1 : i32
    %75 = vector.broadcast %c1_i32_15 : i32 to vector<1x128xi32>
    %76 = arith.cmpi eq, %2, %75 : vector<1x128xi32>
    %77 = vector.shape_cast %76 : vector<1x128xi1> to vector<1x128xi1>
    %78 = vector.broadcast %77 : vector<1x128xi1> to vector<6x128xi1>
    %79 = arith.select %78, %66, %25 : vector<6x128xi1>, vector<6x128xf32>
    %c2 = arith.constant 2 : index
    %c0_16 = arith.constant 0 : index
    %c0_17 = arith.constant 0 : index
    %80 = vector.load %arg1[%c2, %c0_16, %c0_17] : memref<8x6x128xf32, #tpu.memory_space<vmem>>, vector<1x6x128xf32>
    %81 = vector.shape_cast %80 : vector<1x6x128xf32> to vector<6x128xf32>
    %82 = vector.extract_strided_slice %66 {offsets = [0, 0], sizes = [1, 128], strides = [1, 1]} : vector<6x128xf32> to vector<1x128xf32>
    %83 = vector.broadcast %82 : vector<1x128xf32> to vector<6x128xf32>
    %84 = arith.addf %5, %83 : vector<6x128xf32>
    %85 = vector.extract_strided_slice %66 {offsets = [1, 0], sizes = [1, 128], strides = [1, 1]} : vector<6x128xf32> to vector<1x128xf32>
    %86 = vector.broadcast %85 : vector<1x128xf32> to vector<6x128xf32>
    %87 = arith.addf %8, %86 : vector<6x128xf32>
    %88 = arith.cmpf ogt, %87, %84 : vector<6x128xf32>
    %89 = arith.select %88, %87, %84 : vector<6x128xi1>, vector<6x128xf32>
    %c1_i32_18 = arith.constant 1 : i32
    %90 = vector.broadcast %c1_i32_18 : i32 to vector<6x128xi32>
    %91 = arith.select %88, %90, %22 : vector<6x128xi1>, vector<6x128xi32>
    %92 = vector.extract_strided_slice %66 {offsets = [2, 0], sizes = [1, 128], strides = [1, 1]} : vector<6x128xf32> to vector<1x128xf32>
    %93 = vector.broadcast %92 : vector<1x128xf32> to vector<6x128xf32>
    %94 = arith.addf %11, %93 : vector<6x128xf32>
    %95 = arith.cmpf ogt, %94, %89 : vector<6x128xf32>
    %96 = arith.select %95, %94, %89 : vector<6x128xi1>, vector<6x128xf32>
    %c2_i32_19 = arith.constant 2 : i32
    %97 = vector.broadcast %c2_i32_19 : i32 to vector<6x128xi32>
    %98 = arith.select %95, %97, %91 : vector<6x128xi1>, vector<6x128xi32>
    %99 = vector.extract_strided_slice %66 {offsets = [3, 0], sizes = [1, 128], strides = [1, 1]} : vector<6x128xf32> to vector<1x128xf32>
    %100 = vector.broadcast %99 : vector<1x128xf32> to vector<6x128xf32>
    %101 = arith.addf %14, %100 : vector<6x128xf32>
    %102 = arith.cmpf ogt, %101, %96 : vector<6x128xf32>
    %103 = arith.select %102, %101, %96 : vector<6x128xi1>, vector<6x128xf32>
    %c3_i32_20 = arith.constant 3 : i32
    %104 = vector.broadcast %c3_i32_20 : i32 to vector<6x128xi32>
    %105 = arith.select %102, %104, %98 : vector<6x128xi1>, vector<6x128xi32>
    %106 = vector.extract_strided_slice %66 {offsets = [4, 0], sizes = [1, 128], strides = [1, 1]} : vector<6x128xf32> to vector<1x128xf32>
    %107 = vector.broadcast %106 : vector<1x128xf32> to vector<6x128xf32>
    %108 = arith.addf %17, %107 : vector<6x128xf32>
    %109 = arith.cmpf ogt, %108, %103 : vector<6x128xf32>
    %110 = arith.select %109, %108, %103 : vector<6x128xi1>, vector<6x128xf32>
    %c4_i32_21 = arith.constant 4 : i32
    %111 = vector.broadcast %c4_i32_21 : i32 to vector<6x128xi32>
    %112 = arith.select %109, %111, %105 : vector<6x128xi1>, vector<6x128xi32>
    %113 = vector.extract_strided_slice %66 {offsets = [5, 0], sizes = [1, 128], strides = [1, 1]} : vector<6x128xf32> to vector<1x128xf32>
    %114 = vector.broadcast %113 : vector<1x128xf32> to vector<6x128xf32>
    %115 = arith.addf %20, %114 : vector<6x128xf32>
    %116 = arith.cmpf ogt, %115, %110 : vector<6x128xf32>
    %117 = arith.select %116, %115, %110 : vector<6x128xi1>, vector<6x128xf32>
    %c5_i32_22 = arith.constant 5 : i32
    %118 = vector.broadcast %c5_i32_22 : i32 to vector<6x128xi32>
    %119 = arith.select %116, %118, %112 : vector<6x128xi1>, vector<6x128xi32>
    %120 = arith.addf %117, %81 : vector<6x128xf32>
    %c2_i32_23 = arith.constant 2 : i32
    %121 = vector.broadcast %c2_i32_23 : i32 to vector<1x128xi32>
    %122 = arith.cmpi slt, %2, %121 : vector<1x128xi32>
    %c0_i32_24 = arith.constant 0 : i32
    %123 = vector.shape_cast %122 : vector<1x128xi1> to vector<1x128xi1>
    %124 = vector.broadcast %123 : vector<1x128xi1> to vector<6x128xi1>
    %125 = vector.broadcast %c0_i32_24 : i32 to vector<6x128xi32>
    %126 = arith.select %124, %125, %119 : vector<6x128xi1>, vector<6x128xi32>
    %127 = vector.shape_cast %126 : vector<6x128xi32> to vector<1x6x128xi32>
    %c1_25 = arith.constant 1 : index
    %c0_26 = arith.constant 0 : index
    %c0_27 = arith.constant 0 : index
    %128 = vector.load %arg6[%c1_25, %c0_26, %c0_27] : memref<8x6x128xi32, #tpu.memory_space<vmem>>, vector<1x6x128xi32>
    tpu.vector_store %arg6[%c1_25, %c0_26, %c0_27], %127 {strides = array<i32>} : memref<8x6x128xi32, #tpu.memory_space<vmem>>, vector<1x6x128xi32>,
    %c2_i32_28 = arith.constant 2 : i32
    %129 = vector.broadcast %c2_i32_28 : i32 to vector<1x128xi32>
    %130 = arith.cmpi eq, %2, %129 : vector<1x128xi32>
    %131 = vector.shape_cast %130 : vector<1x128xi1> to vector<1x128xi1>
    %132 = vector.broadcast %131 : vector<1x128xi1> to vector<6x128xi1>
    %133 = arith.select %132, %120, %79 : vector<6x128xi1>, vector<6x128xf32>
    %c3 = arith.constant 3 : index
    %c0_29 = arith.constant 0 : index
    %c0_30 = arith.constant 0 : index
    %134 = vector.load %arg1[%c3, %c0_29, %c0_30] : memref<8x6x128xf32, #tpu.memory_space<vmem>>, vector<1x6x128xf32>
    %135 = vector.shape_cast %134 : vector<1x6x128xf32> to vector<6x128xf32>
    %136 = vector.extract_strided_slice %120 {offsets = [0, 0], sizes = [1, 128], strides = [1, 1]} : vector<6x128xf32> to vector<1x128xf32>
    %137 = vector.broadcast %136 : vector<1x128xf32> to vector<6x128xf32>
    %138 = arith.addf %5, %137 : vector<6x128xf32>
    %139 = vector.extract_strided_slice %120 {offsets = [1, 0], sizes = [1, 128], strides = [1, 1]} : vector<6x128xf32> to vector<1x128xf32>
    %140 = vector.broadcast %139 : vector<1x128xf32> to vector<6x128xf32>
    %141 = arith.addf %8, %140 : vector<6x128xf32>
    %142 = arith.cmpf ogt, %141, %138 : vector<6x128xf32>
    %143 = arith.select %142, %141, %138 : vector<6x128xi1>, vector<6x128xf32>
    %c1_i32_31 = arith.constant 1 : i32
    %144 = vector.broadcast %c1_i32_31 : i32 to vector<6x128xi32>
    %145 = arith.select %142, %144, %22 : vector<6x128xi1>, vector<6x128xi32>
    %146 = vector.extract_strided_slice %120 {offsets = [2, 0], sizes = [1, 128], strides = [1, 1]} : vector<6x128xf32> to vector<1x128xf32>
    %147 = vector.broadcast %146 : vector<1x128xf32> to vector<6x128xf32>
    %148 = arith.addf %11, %147 : vector<6x128xf32>
    %149 = arith.cmpf ogt, %148, %143 : vector<6x128xf32>
    %150 = arith.select %149, %148, %143 : vector<6x128xi1>, vector<6x128xf32>
    %c2_i32_32 = arith.constant 2 : i32
    %151 = vector.broadcast %c2_i32_32 : i32 to vector<6x128xi32>
    %152 = arith.select %149, %151, %145 : vector<6x128xi1>, vector<6x128xi32>
    %153 = vector.extract_strided_slice %120 {offsets = [3, 0], sizes = [1, 128], strides = [1, 1]} : vector<6x128xf32> to vector<1x128xf32>
    %154 = vector.broadcast %153 : vector<1x128xf32> to vector<6x128xf32>
    %155 = arith.addf %14, %154 : vector<6x128xf32>
    %156 = arith.cmpf ogt, %155, %150 : vector<6x128xf32>
    %157 = arith.select %156, %155, %150 : vector<6x128xi1>, vector<6x128xf32>
    %c3_i32_33 = arith.constant 3 : i32
    %158 = vector.broadcast %c3_i32_33 : i32 to vector<6x128xi32>
    %159 = arith.select %156, %158, %152 : vector<6x128xi1>, vector<6x128xi32>
    %160 = vector.extract_strided_slice %120 {offsets = [4, 0], sizes = [1, 128], strides = [1, 1]} : vector<6x128xf32> to vector<1x128xf32>
    %161 = vector.broadcast %160 : vector<1x128xf32> to vector<6x128xf32>
    %162 = arith.addf %17, %161 : vector<6x128xf32>
    %163 = arith.cmpf ogt, %162, %157 : vector<6x128xf32>
    %164 = arith.select %163, %162, %157 : vector<6x128xi1>, vector<6x128xf32>
    %c4_i32_34 = arith.constant 4 : i32
    %165 = vector.broadcast %c4_i32_34 : i32 to vector<6x128xi32>
    %166 = arith.select %163, %165, %159 : vector<6x128xi1>, vector<6x128xi32>
    %167 = vector.extract_strided_slice %120 {offsets = [5, 0], sizes = [1, 128], strides = [1, 1]} : vector<6x128xf32> to vector<1x128xf32>
    %168 = vector.broadcast %167 : vector<1x128xf32> to vector<6x128xf32>
    %169 = arith.addf %20, %168 : vector<6x128xf32>
    %170 = arith.cmpf ogt, %169, %164 : vector<6x128xf32>
    %171 = arith.select %170, %169, %164 : vector<6x128xi1>, vector<6x128xf32>
    %c5_i32_35 = arith.constant 5 : i32
    %172 = vector.broadcast %c5_i32_35 : i32 to vector<6x128xi32>
    %173 = arith.select %170, %172, %166 : vector<6x128xi1>, vector<6x128xi32>
    %174 = arith.addf %171, %135 : vector<6x128xf32>
    %c3_i32_36 = arith.constant 3 : i32
    %175 = vector.broadcast %c3_i32_36 : i32 to vector<1x128xi32>
    %176 = arith.cmpi slt, %2, %175 : vector<1x128xi32>
    %c0_i32_37 = arith.constant 0 : i32
    %177 = vector.shape_cast %176 : vector<1x128xi1> to vector<1x128xi1>
    %178 = vector.broadcast %177 : vector<1x128xi1> to vector<6x128xi1>
    %179 = vector.broadcast %c0_i32_37 : i32 to vector<6x128xi32>
    %180 = arith.select %178, %179, %173 : vector<6x128xi1>, vector<6x128xi32>
    %181 = vector.shape_cast %180 : vector<6x128xi32> to vector<1x6x128xi32>
    %c2_38 = arith.constant 2 : index
    %c0_39 = arith.constant 0 : index
    %c0_40 = arith.constant 0 : index
    %182 = vector.load %arg6[%c2_38, %c0_39, %c0_40] : memref<8x6x128xi32, #tpu.memory_space<vmem>>, vector<1x6x128xi32>
    tpu.vector_store %arg6[%c2_38, %c0_39, %c0_40], %181 {strides = array<i32>} : memref<8x6x128xi32, #tpu.memory_space<vmem>>, vector<1x6x128xi32>,
    %c3_i32_41 = arith.constant 3 : i32
    %183 = vector.broadcast %c3_i32_41 : i32 to vector<1x128xi32>
    %184 = arith.cmpi eq, %2, %183 : vector<1x128xi32>
    %185 = vector.shape_cast %184 : vector<1x128xi1> to vector<1x128xi1>
    %186 = vector.broadcast %185 : vector<1x128xi1> to vector<6x128xi1>
    %187 = arith.select %186, %174, %133 : vector<6x128xi1>, vector<6x128xf32>
    %c4 = arith.constant 4 : index
    %c0_42 = arith.constant 0 : index
    %c0_43 = arith.constant 0 : index
    %188 = vector.load %arg1[%c4, %c0_42, %c0_43] : memref<8x6x128xf32, #tpu.memory_space<vmem>>, vector<1x6x128xf32>
    %189 = vector.shape_cast %188 : vector<1x6x128xf32> to vector<6x128xf32>
    %190 = vector.extract_strided_slice %174 {offsets = [0, 0], sizes = [1, 128], strides = [1, 1]} : vector<6x128xf32> to vector<1x128xf32>
    %191 = vector.broadcast %190 : vector<1x128xf32> to vector<6x128xf32>
    %192 = arith.addf %5, %191 : vector<6x128xf32>
    %193 = vector.extract_strided_slice %174 {offsets = [1, 0], sizes = [1, 128], strides = [1, 1]} : vector<6x128xf32> to vector<1x128xf32>
    %194 = vector.broadcast %193 : vector<1x128xf32> to vector<6x128xf32>
    %195 = arith.addf %8, %194 : vector<6x128xf32>
    %196 = arith.cmpf ogt, %195, %192 : vector<6x128xf32>
    %197 = arith.select %196, %195, %192 : vector<6x128xi1>, vector<6x128xf32>
    %c1_i32_44 = arith.constant 1 : i32
    %198 = vector.broadcast %c1_i32_44 : i32 to vector<6x128xi32>
    %199 = arith.select %196, %198, %22 : vector<6x128xi1>, vector<6x128xi32>
    %200 = vector.extract_strided_slice %174 {offsets = [2, 0], sizes = [1, 128], strides = [1, 1]} : vector<6x128xf32> to vector<1x128xf32>
    %201 = vector.broadcast %200 : vector<1x128xf32> to vector<6x128xf32>
    %202 = arith.addf %11, %201 : vector<6x128xf32>
    %203 = arith.cmpf ogt, %202, %197 : vector<6x128xf32>
    %204 = arith.select %203, %202, %197 : vector<6x128xi1>, vector<6x128xf32>
    %c2_i32_45 = arith.constant 2 : i32
    %205 = vector.broadcast %c2_i32_45 : i32 to vector<6x128xi32>
    %206 = arith.select %203, %205, %199 : vector<6x128xi1>, vector<6x128xi32>
    %207 = vector.extract_strided_slice %174 {offsets = [3, 0], sizes = [1, 128], strides = [1, 1]} : vector<6x128xf32> to vector<1x128xf32>
    %208 = vector.broadcast %207 : vector<1x128xf32> to vector<6x128xf32>
    %209 = arith.addf %14, %208 : vector<6x128xf32>
    %210 = arith.cmpf ogt, %209, %204 : vector<6x128xf32>
    %211 = arith.select %210, %209, %204 : vector<6x128xi1>, vector<6x128xf32>
    %c3_i32_46 = arith.constant 3 : i32
    %212 = vector.broadcast %c3_i32_46 : i32 to vector<6x128xi32>
    %213 = arith.select %210, %212, %206 : vector<6x128xi1>, vector<6x128xi32>
    %214 = vector.extract_strided_slice %174 {offsets = [4, 0], sizes = [1, 128], strides = [1, 1]} : vector<6x128xf32> to vector<1x128xf32>
    %215 = vector.broadcast %214 : vector<1x128xf32> to vector<6x128xf32>
    %216 = arith.addf %17, %215 : vector<6x128xf32>
    %217 = arith.cmpf ogt, %216, %211 : vector<6x128xf32>
    %218 = arith.select %217, %216, %211 : vector<6x128xi1>, vector<6x128xf32>
    %c4_i32_47 = arith.constant 4 : i32
    %219 = vector.broadcast %c4_i32_47 : i32 to vector<6x128xi32>
    %220 = arith.select %217, %219, %213 : vector<6x128xi1>, vector<6x128xi32>
    %221 = vector.extract_strided_slice %174 {offsets = [5, 0], sizes = [1, 128], strides = [1, 1]} : vector<6x128xf32> to vector<1x128xf32>
    %222 = vector.broadcast %221 : vector<1x128xf32> to vector<6x128xf32>
    %223 = arith.addf %20, %222 : vector<6x128xf32>
    %224 = arith.cmpf ogt, %223, %218 : vector<6x128xf32>
    %225 = arith.select %224, %223, %218 : vector<6x128xi1>, vector<6x128xf32>
    %c5_i32_48 = arith.constant 5 : i32
    %226 = vector.broadcast %c5_i32_48 : i32 to vector<6x128xi32>
    %227 = arith.select %224, %226, %220 : vector<6x128xi1>, vector<6x128xi32>
    %228 = arith.addf %225, %189 : vector<6x128xf32>
    %c4_i32_49 = arith.constant 4 : i32
    %229 = vector.broadcast %c4_i32_49 : i32 to vector<1x128xi32>
    %230 = arith.cmpi slt, %2, %229 : vector<1x128xi32>
    %c0_i32_50 = arith.constant 0 : i32
    %231 = vector.shape_cast %230 : vector<1x128xi1> to vector<1x128xi1>
    %232 = vector.broadcast %231 : vector<1x128xi1> to vector<6x128xi1>
    %233 = vector.broadcast %c0_i32_50 : i32 to vector<6x128xi32>
    %234 = arith.select %232, %233, %227 : vector<6x128xi1>, vector<6x128xi32>
    %235 = vector.shape_cast %234 : vector<6x128xi32> to vector<1x6x128xi32>
    %c3_51 = arith.constant 3 : index
    %c0_52 = arith.constant 0 : index
    %c0_53 = arith.constant 0 : index
    %236 = vector.load %arg6[%c3_51, %c0_52, %c0_53] : memref<8x6x128xi32, #tpu.memory_space<vmem>>, vector<1x6x128xi32>
    tpu.vector_store %arg6[%c3_51, %c0_52, %c0_53], %235 {strides = array<i32>} : memref<8x6x128xi32, #tpu.memory_space<vmem>>, vector<1x6x128xi32>,
    %c4_i32_54 = arith.constant 4 : i32
    %237 = vector.broadcast %c4_i32_54 : i32 to vector<1x128xi32>
    %238 = arith.cmpi eq, %2, %237 : vector<1x128xi32>
    %239 = vector.shape_cast %238 : vector<1x128xi1> to vector<1x128xi1>
    %240 = vector.broadcast %239 : vector<1x128xi1> to vector<6x128xi1>
    %241 = arith.select %240, %228, %187 : vector<6x128xi1>, vector<6x128xf32>
    %c5 = arith.constant 5 : index
    %c0_55 = arith.constant 0 : index
    %c0_56 = arith.constant 0 : index
    %242 = vector.load %arg1[%c5, %c0_55, %c0_56] : memref<8x6x128xf32, #tpu.memory_space<vmem>>, vector<1x6x128xf32>
    %243 = vector.shape_cast %242 : vector<1x6x128xf32> to vector<6x128xf32>
    %244 = vector.extract_strided_slice %228 {offsets = [0, 0], sizes = [1, 128], strides = [1, 1]} : vector<6x128xf32> to vector<1x128xf32>
    %245 = vector.broadcast %244 : vector<1x128xf32> to vector<6x128xf32>
    %246 = arith.addf %5, %245 : vector<6x128xf32>
    %247 = vector.extract_strided_slice %228 {offsets = [1, 0], sizes = [1, 128], strides = [1, 1]} : vector<6x128xf32> to vector<1x128xf32>
    %248 = vector.broadcast %247 : vector<1x128xf32> to vector<6x128xf32>
    %249 = arith.addf %8, %248 : vector<6x128xf32>
    %250 = arith.cmpf ogt, %249, %246 : vector<6x128xf32>
    %251 = arith.select %250, %249, %246 : vector<6x128xi1>, vector<6x128xf32>
    %c1_i32_57 = arith.constant 1 : i32
    %252 = vector.broadcast %c1_i32_57 : i32 to vector<6x128xi32>
    %253 = arith.select %250, %252, %22 : vector<6x128xi1>, vector<6x128xi32>
    %254 = vector.extract_strided_slice %228 {offsets = [2, 0], sizes = [1, 128], strides = [1, 1]} : vector<6x128xf32> to vector<1x128xf32>
    %255 = vector.broadcast %254 : vector<1x128xf32> to vector<6x128xf32>
    %256 = arith.addf %11, %255 : vector<6x128xf32>
    %257 = arith.cmpf ogt, %256, %251 : vector<6x128xf32>
    %258 = arith.select %257, %256, %251 : vector<6x128xi1>, vector<6x128xf32>
    %c2_i32_58 = arith.constant 2 : i32
    %259 = vector.broadcast %c2_i32_58 : i32 to vector<6x128xi32>
    %260 = arith.select %257, %259, %253 : vector<6x128xi1>, vector<6x128xi32>
    %261 = vector.extract_strided_slice %228 {offsets = [3, 0], sizes = [1, 128], strides = [1, 1]} : vector<6x128xf32> to vector<1x128xf32>
    %262 = vector.broadcast %261 : vector<1x128xf32> to vector<6x128xf32>
    %263 = arith.addf %14, %262 : vector<6x128xf32>
    %264 = arith.cmpf ogt, %263, %258 : vector<6x128xf32>
    %265 = arith.select %264, %263, %258 : vector<6x128xi1>, vector<6x128xf32>
    %c3_i32_59 = arith.constant 3 : i32
    %266 = vector.broadcast %c3_i32_59 : i32 to vector<6x128xi32>
    %267 = arith.select %264, %266, %260 : vector<6x128xi1>, vector<6x128xi32>
    %268 = vector.extract_strided_slice %228 {offsets = [4, 0], sizes = [1, 128], strides = [1, 1]} : vector<6x128xf32> to vector<1x128xf32>
    %269 = vector.broadcast %268 : vector<1x128xf32> to vector<6x128xf32>
    %270 = arith.addf %17, %269 : vector<6x128xf32>
    %271 = arith.cmpf ogt, %270, %265 : vector<6x128xf32>
    %272 = arith.select %271, %270, %265 : vector<6x128xi1>, vector<6x128xf32>
    %c4_i32_60 = arith.constant 4 : i32
    %273 = vector.broadcast %c4_i32_60 : i32 to vector<6x128xi32>
    %274 = arith.select %271, %273, %267 : vector<6x128xi1>, vector<6x128xi32>
    %275 = vector.extract_strided_slice %228 {offsets = [5, 0], sizes = [1, 128], strides = [1, 1]} : vector<6x128xf32> to vector<1x128xf32>
    %276 = vector.broadcast %275 : vector<1x128xf32> to vector<6x128xf32>
    %277 = arith.addf %20, %276 : vector<6x128xf32>
    %278 = arith.cmpf ogt, %277, %272 : vector<6x128xf32>
    %279 = arith.select %278, %277, %272 : vector<6x128xi1>, vector<6x128xf32>
    %c5_i32_61 = arith.constant 5 : i32
    %280 = vector.broadcast %c5_i32_61 : i32 to vector<6x128xi32>
    %281 = arith.select %278, %280, %274 : vector<6x128xi1>, vector<6x128xi32>
    %282 = arith.addf %279, %243 : vector<6x128xf32>
    %c5_i32_62 = arith.constant 5 : i32
    %283 = vector.broadcast %c5_i32_62 : i32 to vector<1x128xi32>
    %284 = arith.cmpi slt, %2, %283 : vector<1x128xi32>
    %c0_i32_63 = arith.constant 0 : i32
    %285 = vector.shape_cast %284 : vector<1x128xi1> to vector<1x128xi1>
    %286 = vector.broadcast %285 : vector<1x128xi1> to vector<6x128xi1>
    %287 = vector.broadcast %c0_i32_63 : i32 to vector<6x128xi32>
    %288 = arith.select %286, %287, %281 : vector<6x128xi1>, vector<6x128xi32>
    %289 = vector.shape_cast %288 : vector<6x128xi32> to vector<1x6x128xi32>
    %c4_64 = arith.constant 4 : index
    %c0_65 = arith.constant 0 : index
    %c0_66 = arith.constant 0 : index
    %290 = vector.load %arg6[%c4_64, %c0_65, %c0_66] : memref<8x6x128xi32, #tpu.memory_space<vmem>>, vector<1x6x128xi32>
    tpu.vector_store %arg6[%c4_64, %c0_65, %c0_66], %289 {strides = array<i32>} : memref<8x6x128xi32, #tpu.memory_space<vmem>>, vector<1x6x128xi32>,
    %c5_i32_67 = arith.constant 5 : i32
    %291 = vector.broadcast %c5_i32_67 : i32 to vector<1x128xi32>
    %292 = arith.cmpi eq, %2, %291 : vector<1x128xi32>
    %293 = vector.shape_cast %292 : vector<1x128xi1> to vector<1x128xi1>
    %294 = vector.broadcast %293 : vector<1x128xi1> to vector<6x128xi1>
    %295 = arith.select %294, %282, %241 : vector<6x128xi1>, vector<6x128xf32>
    %c6 = arith.constant 6 : index
    %c0_68 = arith.constant 0 : index
    %c0_69 = arith.constant 0 : index
    %296 = vector.load %arg1[%c6, %c0_68, %c0_69] : memref<8x6x128xf32, #tpu.memory_space<vmem>>, vector<1x6x128xf32>
    %297 = vector.shape_cast %296 : vector<1x6x128xf32> to vector<6x128xf32>
    %298 = vector.extract_strided_slice %282 {offsets = [0, 0], sizes = [1, 128], strides = [1, 1]} : vector<6x128xf32> to vector<1x128xf32>
    %299 = vector.broadcast %298 : vector<1x128xf32> to vector<6x128xf32>
    %300 = arith.addf %5, %299 : vector<6x128xf32>
    %301 = vector.extract_strided_slice %282 {offsets = [1, 0], sizes = [1, 128], strides = [1, 1]} : vector<6x128xf32> to vector<1x128xf32>
    %302 = vector.broadcast %301 : vector<1x128xf32> to vector<6x128xf32>
    %303 = arith.addf %8, %302 : vector<6x128xf32>
    %304 = arith.cmpf ogt, %303, %300 : vector<6x128xf32>
    %305 = arith.select %304, %303, %300 : vector<6x128xi1>, vector<6x128xf32>
    %c1_i32_70 = arith.constant 1 : i32
    %306 = vector.broadcast %c1_i32_70 : i32 to vector<6x128xi32>
    %307 = arith.select %304, %306, %22 : vector<6x128xi1>, vector<6x128xi32>
    %308 = vector.extract_strided_slice %282 {offsets = [2, 0], sizes = [1, 128], strides = [1, 1]} : vector<6x128xf32> to vector<1x128xf32>
    %309 = vector.broadcast %308 : vector<1x128xf32> to vector<6x128xf32>
    %310 = arith.addf %11, %309 : vector<6x128xf32>
    %311 = arith.cmpf ogt, %310, %305 : vector<6x128xf32>
    %312 = arith.select %311, %310, %305 : vector<6x128xi1>, vector<6x128xf32>
    %c2_i32_71 = arith.constant 2 : i32
    %313 = vector.broadcast %c2_i32_71 : i32 to vector<6x128xi32>
    %314 = arith.select %311, %313, %307 : vector<6x128xi1>, vector<6x128xi32>
    %315 = vector.extract_strided_slice %282 {offsets = [3, 0], sizes = [1, 128], strides = [1, 1]} : vector<6x128xf32> to vector<1x128xf32>
    %316 = vector.broadcast %315 : vector<1x128xf32> to vector<6x128xf32>
    %317 = arith.addf %14, %316 : vector<6x128xf32>
    %318 = arith.cmpf ogt, %317, %312 : vector<6x128xf32>
    %319 = arith.select %318, %317, %312 : vector<6x128xi1>, vector<6x128xf32>
    %c3_i32_72 = arith.constant 3 : i32
    %320 = vector.broadcast %c3_i32_72 : i32 to vector<6x128xi32>
    %321 = arith.select %318, %320, %314 : vector<6x128xi1>, vector<6x128xi32>
    %322 = vector.extract_strided_slice %282 {offsets = [4, 0], sizes = [1, 128], strides = [1, 1]} : vector<6x128xf32> to vector<1x128xf32>
    %323 = vector.broadcast %322 : vector<1x128xf32> to vector<6x128xf32>
    %324 = arith.addf %17, %323 : vector<6x128xf32>
    %325 = arith.cmpf ogt, %324, %319 : vector<6x128xf32>
    %326 = arith.select %325, %324, %319 : vector<6x128xi1>, vector<6x128xf32>
    %c4_i32_73 = arith.constant 4 : i32
    %327 = vector.broadcast %c4_i32_73 : i32 to vector<6x128xi32>
    %328 = arith.select %325, %327, %321 : vector<6x128xi1>, vector<6x128xi32>
    %329 = vector.extract_strided_slice %282 {offsets = [5, 0], sizes = [1, 128], strides = [1, 1]} : vector<6x128xf32> to vector<1x128xf32>
    %330 = vector.broadcast %329 : vector<1x128xf32> to vector<6x128xf32>
    %331 = arith.addf %20, %330 : vector<6x128xf32>
    %332 = arith.cmpf ogt, %331, %326 : vector<6x128xf32>
    %333 = arith.select %332, %331, %326 : vector<6x128xi1>, vector<6x128xf32>
    %c5_i32_74 = arith.constant 5 : i32
    %334 = vector.broadcast %c5_i32_74 : i32 to vector<6x128xi32>
    %335 = arith.select %332, %334, %328 : vector<6x128xi1>, vector<6x128xi32>
    %336 = arith.addf %333, %297 : vector<6x128xf32>
    %c6_i32 = arith.constant 6 : i32
    %337 = vector.broadcast %c6_i32 : i32 to vector<1x128xi32>
    %338 = arith.cmpi slt, %2, %337 : vector<1x128xi32>
    %c0_i32_75 = arith.constant 0 : i32
    %339 = vector.shape_cast %338 : vector<1x128xi1> to vector<1x128xi1>
    %340 = vector.broadcast %339 : vector<1x128xi1> to vector<6x128xi1>
    %341 = vector.broadcast %c0_i32_75 : i32 to vector<6x128xi32>
    %342 = arith.select %340, %341, %335 : vector<6x128xi1>, vector<6x128xi32>
    %343 = vector.shape_cast %342 : vector<6x128xi32> to vector<1x6x128xi32>
    %c5_76 = arith.constant 5 : index
    %c0_77 = arith.constant 0 : index
    %c0_78 = arith.constant 0 : index
    %344 = vector.load %arg6[%c5_76, %c0_77, %c0_78] : memref<8x6x128xi32, #tpu.memory_space<vmem>>, vector<1x6x128xi32>
    tpu.vector_store %arg6[%c5_76, %c0_77, %c0_78], %343 {strides = array<i32>} : memref<8x6x128xi32, #tpu.memory_space<vmem>>, vector<1x6x128xi32>,
    %c6_i32_79 = arith.constant 6 : i32
    %345 = vector.broadcast %c6_i32_79 : i32 to vector<1x128xi32>
    %346 = arith.cmpi eq, %2, %345 : vector<1x128xi32>
    %347 = vector.shape_cast %346 : vector<1x128xi1> to vector<1x128xi1>
    %348 = vector.broadcast %347 : vector<1x128xi1> to vector<6x128xi1>
    %349 = arith.select %348, %336, %295 : vector<6x128xi1>, vector<6x128xf32>
    %c7 = arith.constant 7 : index
    %c0_80 = arith.constant 0 : index
    %c0_81 = arith.constant 0 : index
    %350 = vector.load %arg1[%c7, %c0_80, %c0_81] : memref<8x6x128xf32, #tpu.memory_space<vmem>>, vector<1x6x128xf32>
    %351 = vector.shape_cast %350 : vector<1x6x128xf32> to vector<6x128xf32>
    %352 = vector.extract_strided_slice %336 {offsets = [0, 0], sizes = [1, 128], strides = [1, 1]} : vector<6x128xf32> to vector<1x128xf32>
    %353 = vector.broadcast %352 : vector<1x128xf32> to vector<6x128xf32>
    %354 = arith.addf %5, %353 : vector<6x128xf32>
    %355 = vector.extract_strided_slice %336 {offsets = [1, 0], sizes = [1, 128], strides = [1, 1]} : vector<6x128xf32> to vector<1x128xf32>
    %356 = vector.broadcast %355 : vector<1x128xf32> to vector<6x128xf32>
    %357 = arith.addf %8, %356 : vector<6x128xf32>
    %358 = arith.cmpf ogt, %357, %354 : vector<6x128xf32>
    %359 = arith.select %358, %357, %354 : vector<6x128xi1>, vector<6x128xf32>
    %c1_i32_82 = arith.constant 1 : i32
    %360 = vector.broadcast %c1_i32_82 : i32 to vector<6x128xi32>
    %361 = arith.select %358, %360, %22 : vector<6x128xi1>, vector<6x128xi32>
    %362 = vector.extract_strided_slice %336 {offsets = [2, 0], sizes = [1, 128], strides = [1, 1]} : vector<6x128xf32> to vector<1x128xf32>
    %363 = vector.broadcast %362 : vector<1x128xf32> to vector<6x128xf32>
    %364 = arith.addf %11, %363 : vector<6x128xf32>
    %365 = arith.cmpf ogt, %364, %359 : vector<6x128xf32>
    %366 = arith.select %365, %364, %359 : vector<6x128xi1>, vector<6x128xf32>
    %c2_i32_83 = arith.constant 2 : i32
    %367 = vector.broadcast %c2_i32_83 : i32 to vector<6x128xi32>
    %368 = arith.select %365, %367, %361 : vector<6x128xi1>, vector<6x128xi32>
    %369 = vector.extract_strided_slice %336 {offsets = [3, 0], sizes = [1, 128], strides = [1, 1]} : vector<6x128xf32> to vector<1x128xf32>
    %370 = vector.broadcast %369 : vector<1x128xf32> to vector<6x128xf32>
    %371 = arith.addf %14, %370 : vector<6x128xf32>
    %372 = arith.cmpf ogt, %371, %366 : vector<6x128xf32>
    %373 = arith.select %372, %371, %366 : vector<6x128xi1>, vector<6x128xf32>
    %c3_i32_84 = arith.constant 3 : i32
    %374 = vector.broadcast %c3_i32_84 : i32 to vector<6x128xi32>
    %375 = arith.select %372, %374, %368 : vector<6x128xi1>, vector<6x128xi32>
    %376 = vector.extract_strided_slice %336 {offsets = [4, 0], sizes = [1, 128], strides = [1, 1]} : vector<6x128xf32> to vector<1x128xf32>
    %377 = vector.broadcast %376 : vector<1x128xf32> to vector<6x128xf32>
    %378 = arith.addf %17, %377 : vector<6x128xf32>
    %379 = arith.cmpf ogt, %378, %373 : vector<6x128xf32>
    %380 = arith.select %379, %378, %373 : vector<6x128xi1>, vector<6x128xf32>
    %c4_i32_85 = arith.constant 4 : i32
    %381 = vector.broadcast %c4_i32_85 : i32 to vector<6x128xi32>
    %382 = arith.select %379, %381, %375 : vector<6x128xi1>, vector<6x128xi32>
    %383 = vector.extract_strided_slice %336 {offsets = [5, 0], sizes = [1, 128], strides = [1, 1]} : vector<6x128xf32> to vector<1x128xf32>
    %384 = vector.broadcast %383 : vector<1x128xf32> to vector<6x128xf32>
    %385 = arith.addf %20, %384 : vector<6x128xf32>
    %386 = arith.cmpf ogt, %385, %380 : vector<6x128xf32>
    %387 = arith.select %386, %385, %380 : vector<6x128xi1>, vector<6x128xf32>
    %c5_i32_86 = arith.constant 5 : i32
    %388 = vector.broadcast %c5_i32_86 : i32 to vector<6x128xi32>
    %389 = arith.select %386, %388, %382 : vector<6x128xi1>, vector<6x128xi32>
    %390 = arith.addf %387, %351 : vector<6x128xf32>
    %c7_i32 = arith.constant 7 : i32
    %391 = vector.broadcast %c7_i32 : i32 to vector<1x128xi32>
    %392 = arith.cmpi slt, %2, %391 : vector<1x128xi32>
    %c0_i32_87 = arith.constant 0 : i32
    %393 = vector.shape_cast %392 : vector<1x128xi1> to vector<1x128xi1>
    %394 = vector.broadcast %393 : vector<1x128xi1> to vector<6x128xi1>
    %395 = vector.broadcast %c0_i32_87 : i32 to vector<6x128xi32>
    %396 = arith.select %394, %395, %389 : vector<6x128xi1>, vector<6x128xi32>
    %397 = vector.shape_cast %396 : vector<6x128xi32> to vector<1x6x128xi32>
    %c6_88 = arith.constant 6 : index
    %c0_89 = arith.constant 0 : index
    %c0_90 = arith.constant 0 : index
    %398 = vector.load %arg6[%c6_88, %c0_89, %c0_90] : memref<8x6x128xi32, #tpu.memory_space<vmem>>, vector<1x6x128xi32>
    tpu.vector_store %arg6[%c6_88, %c0_89, %c0_90], %397 {strides = array<i32>} : memref<8x6x128xi32, #tpu.memory_space<vmem>>, vector<1x6x128xi32>,
    %c7_i32_91 = arith.constant 7 : i32
    %399 = vector.broadcast %c7_i32_91 : i32 to vector<1x128xi32>
    %400 = arith.cmpi eq, %2, %399 : vector<1x128xi32>
    %401 = vector.shape_cast %400 : vector<1x128xi1> to vector<1x128xi1>
    %402 = vector.broadcast %401 : vector<1x128xi1> to vector<6x128xi1>
    %403 = arith.select %402, %390, %349 : vector<6x128xi1>, vector<6x128xf32>
    %c0_i32_92 = arith.constant 0 : i32
    %404 = vector.broadcast %c0_i32_92 : i32 to vector<1x6x128xi32>
    %c7_93 = arith.constant 7 : index
    %c0_94 = arith.constant 0 : index
    %c0_95 = arith.constant 0 : index
    %405 = vector.load %arg6[%c7_93, %c0_94, %c0_95] : memref<8x6x128xi32, #tpu.memory_space<vmem>>, vector<1x6x128xi32>
    tpu.vector_store %arg6[%c7_93, %c0_94, %c0_95], %404 {strides = array<i32>} : memref<8x6x128xi32, #tpu.memory_space<vmem>>, vector<1x6x128xi32>,
    %406 = vector.broadcast %1 : vector<6x1xf32> to vector<6x128xf32>
    %407 = arith.addf %403, %406 : vector<6x128xf32>
    %cst = arith.constant dense<0xFF800000> : vector<128xf32>
    %408 = vector.multi_reduction <maximumf>, %407, %cst [0] : vector<6x128xf32> to vector<128xf32>
    %409 = vector.shape_cast %408 : vector<128xf32> to vector<1x128xf32>
    %410 = vector.broadcast %409 : vector<1x128xf32> to vector<6x128xf32>
    %411 = arith.cmpf oeq, %407, %410 : vector<6x128xf32>
    %c6_i32_96 = arith.constant 6 : i32
    %412 = vector.broadcast %c6_i32_96 : i32 to vector<6x128xi32>
    %413 = arith.select %411, %21, %412 : vector<6x128xi1>, vector<6x128xi32>
    %cst_97 = arith.constant dense<2147483647> : vector<128xi32>
    %414 = vector.multi_reduction <minsi>, %413, %cst_97 [0] : vector<6x128xi32> to vector<128xi32>
    %415 = vector.shape_cast %414 : vector<128xi32> to vector<1x128xi32>
    %c7_98 = arith.constant 7 : index
    %c0_99 = arith.constant 0 : index
    %416 = vector.load %arg5[%c7_98, %c0_99] : memref<8x128xi32, #tpu.memory_space<vmem>>, vector<1x128xi32>
    tpu.vector_store %arg5[%c7_98, %c0_99], %415 {strides = array<i32>} : memref<8x128xi32, #tpu.memory_space<vmem>>, vector<1x128xi32>,
    %c6_100 = arith.constant 6 : index
    %c0_101 = arith.constant 0 : index
    %c0_102 = arith.constant 0 : index
    %417 = vector.load %arg6[%c6_100, %c0_101, %c0_102] : memref<8x6x128xi32, #tpu.memory_space<vmem>>, vector<1x6x128xi32>
    %418 = vector.shape_cast %417 : vector<1x6x128xi32> to vector<6x128xi32>
    %c6_i32_103 = arith.constant 6 : i32
    %419 = vector.broadcast %c6_i32_103 : i32 to vector<1x128xi32>
    %420 = arith.cmpi eq, %2, %419 : vector<1x128xi32>
    %421 = vector.shape_cast %420 : vector<1x128xi1> to vector<1x128xi1>
    %422 = vector.broadcast %421 : vector<1x128xi1> to vector<6x128xi1>
    %423 = vector.shape_cast %415 : vector<1x128xi32> to vector<1x128xi32>
    %424 = vector.broadcast %423 : vector<1x128xi32> to vector<6x128xi32>
    %425 = arith.select %422, %424, %418 : vector<6x128xi1>, vector<6x128xi32>
    %426 = vector.extract_strided_slice %425 {offsets = [0, 0], sizes = [1, 128], strides = [1, 1]} : vector<6x128xi32> to vector<1x128xi32>
    %c1_i32_104 = arith.constant 1 : i32
    %427 = vector.broadcast %c1_i32_104 : i32 to vector<1x128xi32>
    %428 = arith.cmpi eq, %415, %427 : vector<1x128xi32>
    %429 = vector.extract_strided_slice %425 {offsets = [1, 0], sizes = [1, 128], strides = [1, 1]} : vector<6x128xi32> to vector<1x128xi32>
    %430 = arith.select %428, %429, %426 : vector<1x128xi1>, vector<1x128xi32>
    %c2_i32_105 = arith.constant 2 : i32
    %431 = vector.broadcast %c2_i32_105 : i32 to vector<1x128xi32>
    %432 = arith.cmpi eq, %415, %431 : vector<1x128xi32>
    %433 = vector.extract_strided_slice %425 {offsets = [2, 0], sizes = [1, 128], strides = [1, 1]} : vector<6x128xi32> to vector<1x128xi32>
    %434 = arith.select %432, %433, %430 : vector<1x128xi1>, vector<1x128xi32>
    %c3_i32_106 = arith.constant 3 : i32
    %435 = vector.broadcast %c3_i32_106 : i32 to vector<1x128xi32>
    %436 = arith.cmpi eq, %415, %435 : vector<1x128xi32>
    %437 = vector.extract_strided_slice %425 {offsets = [3, 0], sizes = [1, 128], strides = [1, 1]} : vector<6x128xi32> to vector<1x128xi32>
    %438 = arith.select %436, %437, %434 : vector<1x128xi1>, vector<1x128xi32>
    %c4_i32_107 = arith.constant 4 : i32
    %439 = vector.broadcast %c4_i32_107 : i32 to vector<1x128xi32>
    %440 = arith.cmpi eq, %415, %439 : vector<1x128xi32>
    %441 = vector.extract_strided_slice %425 {offsets = [4, 0], sizes = [1, 128], strides = [1, 1]} : vector<6x128xi32> to vector<1x128xi32>
    %442 = arith.select %440, %441, %438 : vector<1x128xi1>, vector<1x128xi32>
    %c5_i32_108 = arith.constant 5 : i32
    %443 = vector.broadcast %c5_i32_108 : i32 to vector<1x128xi32>
    %444 = arith.cmpi eq, %415, %443 : vector<1x128xi32>
    %445 = vector.extract_strided_slice %425 {offsets = [5, 0], sizes = [1, 128], strides = [1, 1]} : vector<6x128xi32> to vector<1x128xi32>
    %446 = arith.select %444, %445, %442 : vector<1x128xi1>, vector<1x128xi32>
    %c6_109 = arith.constant 6 : index
    %c0_110 = arith.constant 0 : index
    %447 = vector.load %arg5[%c6_109, %c0_110] : memref<8x128xi32, #tpu.memory_space<vmem>>, vector<1x128xi32>
    tpu.vector_store %arg5[%c6_109, %c0_110], %446 {strides = array<i32>} : memref<8x128xi32, #tpu.memory_space<vmem>>, vector<1x128xi32>,
    %c5_111 = arith.constant 5 : index
    %c0_112 = arith.constant 0 : index
    %c0_113 = arith.constant 0 : index
    %448 = vector.load %arg6[%c5_111, %c0_112, %c0_113] : memref<8x6x128xi32, #tpu.memory_space<vmem>>, vector<1x6x128xi32>
    %449 = vector.shape_cast %448 : vector<1x6x128xi32> to vector<6x128xi32>
    %c5_i32_114 = arith.constant 5 : i32
    %450 = vector.broadcast %c5_i32_114 : i32 to vector<1x128xi32>
    %451 = arith.cmpi eq, %2, %450 : vector<1x128xi32>
    %452 = vector.shape_cast %451 : vector<1x128xi1> to vector<1x128xi1>
    %453 = vector.broadcast %452 : vector<1x128xi1> to vector<6x128xi1>
    %454 = vector.shape_cast %415 : vector<1x128xi32> to vector<1x128xi32>
    %455 = vector.broadcast %454 : vector<1x128xi32> to vector<6x128xi32>
    %456 = arith.select %453, %455, %449 : vector<6x128xi1>, vector<6x128xi32>
    %457 = vector.extract_strided_slice %456 {offsets = [0, 0], sizes = [1, 128], strides = [1, 1]} : vector<6x128xi32> to vector<1x128xi32>
    %c1_i32_115 = arith.constant 1 : i32
    %458 = vector.broadcast %c1_i32_115 : i32 to vector<1x128xi32>
    %459 = arith.cmpi eq, %446, %458 : vector<1x128xi32>
    %460 = vector.extract_strided_slice %456 {offsets = [1, 0], sizes = [1, 128], strides = [1, 1]} : vector<6x128xi32> to vector<1x128xi32>
    %461 = arith.select %459, %460, %457 : vector<1x128xi1>, vector<1x128xi32>
    %c2_i32_116 = arith.constant 2 : i32
    %462 = vector.broadcast %c2_i32_116 : i32 to vector<1x128xi32>
    %463 = arith.cmpi eq, %446, %462 : vector<1x128xi32>
    %464 = vector.extract_strided_slice %456 {offsets = [2, 0], sizes = [1, 128], strides = [1, 1]} : vector<6x128xi32> to vector<1x128xi32>
    %465 = arith.select %463, %464, %461 : vector<1x128xi1>, vector<1x128xi32>
    %c3_i32_117 = arith.constant 3 : i32
    %466 = vector.broadcast %c3_i32_117 : i32 to vector<1x128xi32>
    %467 = arith.cmpi eq, %446, %466 : vector<1x128xi32>
    %468 = vector.extract_strided_slice %456 {offsets = [3, 0], sizes = [1, 128], strides = [1, 1]} : vector<6x128xi32> to vector<1x128xi32>
    %469 = arith.select %467, %468, %465 : vector<1x128xi1>, vector<1x128xi32>
    %c4_i32_118 = arith.constant 4 : i32
    %470 = vector.broadcast %c4_i32_118 : i32 to vector<1x128xi32>
    %471 = arith.cmpi eq, %446, %470 : vector<1x128xi32>
    %472 = vector.extract_strided_slice %456 {offsets = [4, 0], sizes = [1, 128], strides = [1, 1]} : vector<6x128xi32> to vector<1x128xi32>
    %473 = arith.select %471, %472, %469 : vector<1x128xi1>, vector<1x128xi32>
    %c5_i32_119 = arith.constant 5 : i32
    %474 = vector.broadcast %c5_i32_119 : i32 to vector<1x128xi32>
    %475 = arith.cmpi eq, %446, %474 : vector<1x128xi32>
    %476 = vector.extract_strided_slice %456 {offsets = [5, 0], sizes = [1, 128], strides = [1, 1]} : vector<6x128xi32> to vector<1x128xi32>
    %477 = arith.select %475, %476, %473 : vector<1x128xi1>, vector<1x128xi32>
    %c5_120 = arith.constant 5 : index
    %c0_121 = arith.constant 0 : index
    %478 = vector.load %arg5[%c5_120, %c0_121] : memref<8x128xi32, #tpu.memory_space<vmem>>, vector<1x128xi32>
    tpu.vector_store %arg5[%c5_120, %c0_121], %477 {strides = array<i32>} : memref<8x128xi32, #tpu.memory_space<vmem>>, vector<1x128xi32>,
    %c4_122 = arith.constant 4 : index
    %c0_123 = arith.constant 0 : index
    %c0_124 = arith.constant 0 : index
    %479 = vector.load %arg6[%c4_122, %c0_123, %c0_124] : memref<8x6x128xi32, #tpu.memory_space<vmem>>, vector<1x6x128xi32>
    %480 = vector.shape_cast %479 : vector<1x6x128xi32> to vector<6x128xi32>
    %c4_i32_125 = arith.constant 4 : i32
    %481 = vector.broadcast %c4_i32_125 : i32 to vector<1x128xi32>
    %482 = arith.cmpi eq, %2, %481 : vector<1x128xi32>
    %483 = vector.shape_cast %482 : vector<1x128xi1> to vector<1x128xi1>
    %484 = vector.broadcast %483 : vector<1x128xi1> to vector<6x128xi1>
    %485 = vector.shape_cast %415 : vector<1x128xi32> to vector<1x128xi32>
    %486 = vector.broadcast %485 : vector<1x128xi32> to vector<6x128xi32>
    %487 = arith.select %484, %486, %480 : vector<6x128xi1>, vector<6x128xi32>
    %488 = vector.extract_strided_slice %487 {offsets = [0, 0], sizes = [1, 128], strides = [1, 1]} : vector<6x128xi32> to vector<1x128xi32>
    %c1_i32_126 = arith.constant 1 : i32
    %489 = vector.broadcast %c1_i32_126 : i32 to vector<1x128xi32>
    %490 = arith.cmpi eq, %477, %489 : vector<1x128xi32>
    %491 = vector.extract_strided_slice %487 {offsets = [1, 0], sizes = [1, 128], strides = [1, 1]} : vector<6x128xi32> to vector<1x128xi32>
    %492 = arith.select %490, %491, %488 : vector<1x128xi1>, vector<1x128xi32>
    %c2_i32_127 = arith.constant 2 : i32
    %493 = vector.broadcast %c2_i32_127 : i32 to vector<1x128xi32>
    %494 = arith.cmpi eq, %477, %493 : vector<1x128xi32>
    %495 = vector.extract_strided_slice %487 {offsets = [2, 0], sizes = [1, 128], strides = [1, 1]} : vector<6x128xi32> to vector<1x128xi32>
    %496 = arith.select %494, %495, %492 : vector<1x128xi1>, vector<1x128xi32>
    %c3_i32_128 = arith.constant 3 : i32
    %497 = vector.broadcast %c3_i32_128 : i32 to vector<1x128xi32>
    %498 = arith.cmpi eq, %477, %497 : vector<1x128xi32>
    %499 = vector.extract_strided_slice %487 {offsets = [3, 0], sizes = [1, 128], strides = [1, 1]} : vector<6x128xi32> to vector<1x128xi32>
    %500 = arith.select %498, %499, %496 : vector<1x128xi1>, vector<1x128xi32>
    %c4_i32_129 = arith.constant 4 : i32
    %501 = vector.broadcast %c4_i32_129 : i32 to vector<1x128xi32>
    %502 = arith.cmpi eq, %477, %501 : vector<1x128xi32>
    %503 = vector.extract_strided_slice %487 {offsets = [4, 0], sizes = [1, 128], strides = [1, 1]} : vector<6x128xi32> to vector<1x128xi32>
    %504 = arith.select %502, %503, %500 : vector<1x128xi1>, vector<1x128xi32>
    %c5_i32_130 = arith.constant 5 : i32
    %505 = vector.broadcast %c5_i32_130 : i32 to vector<1x128xi32>
    %506 = arith.cmpi eq, %477, %505 : vector<1x128xi32>
    %507 = vector.extract_strided_slice %487 {offsets = [5, 0], sizes = [1, 128], strides = [1, 1]} : vector<6x128xi32> to vector<1x128xi32>
    %508 = arith.select %506, %507, %504 : vector<1x128xi1>, vector<1x128xi32>
    %c4_131 = arith.constant 4 : index
    %c0_132 = arith.constant 0 : index
    %509 = vector.load %arg5[%c4_131, %c0_132] : memref<8x128xi32, #tpu.memory_space<vmem>>, vector<1x128xi32>
    tpu.vector_store %arg5[%c4_131, %c0_132], %508 {strides = array<i32>} : memref<8x128xi32, #tpu.memory_space<vmem>>, vector<1x128xi32>,
    %c3_133 = arith.constant 3 : index
    %c0_134 = arith.constant 0 : index
    %c0_135 = arith.constant 0 : index
    %510 = vector.load %arg6[%c3_133, %c0_134, %c0_135] : memref<8x6x128xi32, #tpu.memory_space<vmem>>, vector<1x6x128xi32>
    %511 = vector.shape_cast %510 : vector<1x6x128xi32> to vector<6x128xi32>
    %c3_i32_136 = arith.constant 3 : i32
    %512 = vector.broadcast %c3_i32_136 : i32 to vector<1x128xi32>
    %513 = arith.cmpi eq, %2, %512 : vector<1x128xi32>
    %514 = vector.shape_cast %513 : vector<1x128xi1> to vector<1x128xi1>
    %515 = vector.broadcast %514 : vector<1x128xi1> to vector<6x128xi1>
    %516 = vector.shape_cast %415 : vector<1x128xi32> to vector<1x128xi32>
    %517 = vector.broadcast %516 : vector<1x128xi32> to vector<6x128xi32>
    %518 = arith.select %515, %517, %511 : vector<6x128xi1>, vector<6x128xi32>
    %519 = vector.extract_strided_slice %518 {offsets = [0, 0], sizes = [1, 128], strides = [1, 1]} : vector<6x128xi32> to vector<1x128xi32>
    %c1_i32_137 = arith.constant 1 : i32
    %520 = vector.broadcast %c1_i32_137 : i32 to vector<1x128xi32>
    %521 = arith.cmpi eq, %508, %520 : vector<1x128xi32>
    %522 = vector.extract_strided_slice %518 {offsets = [1, 0], sizes = [1, 128], strides = [1, 1]} : vector<6x128xi32> to vector<1x128xi32>
    %523 = arith.select %521, %522, %519 : vector<1x128xi1>, vector<1x128xi32>
    %c2_i32_138 = arith.constant 2 : i32
    %524 = vector.broadcast %c2_i32_138 : i32 to vector<1x128xi32>
    %525 = arith.cmpi eq, %508, %524 : vector<1x128xi32>
    %526 = vector.extract_strided_slice %518 {offsets = [2, 0], sizes = [1, 128], strides = [1, 1]} : vector<6x128xi32> to vector<1x128xi32>
    %527 = arith.select %525, %526, %523 : vector<1x128xi1>, vector<1x128xi32>
    %c3_i32_139 = arith.constant 3 : i32
    %528 = vector.broadcast %c3_i32_139 : i32 to vector<1x128xi32>
    %529 = arith.cmpi eq, %508, %528 : vector<1x128xi32>
    %530 = vector.extract_strided_slice %518 {offsets = [3, 0], sizes = [1, 128], strides = [1, 1]} : vector<6x128xi32> to vector<1x128xi32>
    %531 = arith.select %529, %530, %527 : vector<1x128xi1>, vector<1x128xi32>
    %c4_i32_140 = arith.constant 4 : i32
    %532 = vector.broadcast %c4_i32_140 : i32 to vector<1x128xi32>
    %533 = arith.cmpi eq, %508, %532 : vector<1x128xi32>
    %534 = vector.extract_strided_slice %518 {offsets = [4, 0], sizes = [1, 128], strides = [1, 1]} : vector<6x128xi32> to vector<1x128xi32>
    %535 = arith.select %533, %534, %531 : vector<1x128xi1>, vector<1x128xi32>
    %c5_i32_141 = arith.constant 5 : i32
    %536 = vector.broadcast %c5_i32_141 : i32 to vector<1x128xi32>
    %537 = arith.cmpi eq, %508, %536 : vector<1x128xi32>
    %538 = vector.extract_strided_slice %518 {offsets = [5, 0], sizes = [1, 128], strides = [1, 1]} : vector<6x128xi32> to vector<1x128xi32>
    %539 = arith.select %537, %538, %535 : vector<1x128xi1>, vector<1x128xi32>
    %c3_142 = arith.constant 3 : index
    %c0_143 = arith.constant 0 : index
    %540 = vector.load %arg5[%c3_142, %c0_143] : memref<8x128xi32, #tpu.memory_space<vmem>>, vector<1x128xi32>
    tpu.vector_store %arg5[%c3_142, %c0_143], %539 {strides = array<i32>} : memref<8x128xi32, #tpu.memory_space<vmem>>, vector<1x128xi32>,
    %c2_144 = arith.constant 2 : index
    %c0_145 = arith.constant 0 : index
    %c0_146 = arith.constant 0 : index
    %541 = vector.load %arg6[%c2_144, %c0_145, %c0_146] : memref<8x6x128xi32, #tpu.memory_space<vmem>>, vector<1x6x128xi32>
    %542 = vector.shape_cast %541 : vector<1x6x128xi32> to vector<6x128xi32>
    %c2_i32_147 = arith.constant 2 : i32
    %543 = vector.broadcast %c2_i32_147 : i32 to vector<1x128xi32>
    %544 = arith.cmpi eq, %2, %543 : vector<1x128xi32>
    %545 = vector.shape_cast %544 : vector<1x128xi1> to vector<1x128xi1>
    %546 = vector.broadcast %545 : vector<1x128xi1> to vector<6x128xi1>
    %547 = vector.shape_cast %415 : vector<1x128xi32> to vector<1x128xi32>
    %548 = vector.broadcast %547 : vector<1x128xi32> to vector<6x128xi32>
    %549 = arith.select %546, %548, %542 : vector<6x128xi1>, vector<6x128xi32>
    %550 = vector.extract_strided_slice %549 {offsets = [0, 0], sizes = [1, 128], strides = [1, 1]} : vector<6x128xi32> to vector<1x128xi32>
    %c1_i32_148 = arith.constant 1 : i32
    %551 = vector.broadcast %c1_i32_148 : i32 to vector<1x128xi32>
    %552 = arith.cmpi eq, %539, %551 : vector<1x128xi32>
    %553 = vector.extract_strided_slice %549 {offsets = [1, 0], sizes = [1, 128], strides = [1, 1]} : vector<6x128xi32> to vector<1x128xi32>
    %554 = arith.select %552, %553, %550 : vector<1x128xi1>, vector<1x128xi32>
    %c2_i32_149 = arith.constant 2 : i32
    %555 = vector.broadcast %c2_i32_149 : i32 to vector<1x128xi32>
    %556 = arith.cmpi eq, %539, %555 : vector<1x128xi32>
    %557 = vector.extract_strided_slice %549 {offsets = [2, 0], sizes = [1, 128], strides = [1, 1]} : vector<6x128xi32> to vector<1x128xi32>
    %558 = arith.select %556, %557, %554 : vector<1x128xi1>, vector<1x128xi32>
    %c3_i32_150 = arith.constant 3 : i32
    %559 = vector.broadcast %c3_i32_150 : i32 to vector<1x128xi32>
    %560 = arith.cmpi eq, %539, %559 : vector<1x128xi32>
    %561 = vector.extract_strided_slice %549 {offsets = [3, 0], sizes = [1, 128], strides = [1, 1]} : vector<6x128xi32> to vector<1x128xi32>
    %562 = arith.select %560, %561, %558 : vector<1x128xi1>, vector<1x128xi32>
    %c4_i32_151 = arith.constant 4 : i32
    %563 = vector.broadcast %c4_i32_151 : i32 to vector<1x128xi32>
    %564 = arith.cmpi eq, %539, %563 : vector<1x128xi32>
    %565 = vector.extract_strided_slice %549 {offsets = [4, 0], sizes = [1, 128], strides = [1, 1]} : vector<6x128xi32> to vector<1x128xi32>
    %566 = arith.select %564, %565, %562 : vector<1x128xi1>, vector<1x128xi32>
    %c5_i32_152 = arith.constant 5 : i32
    %567 = vector.broadcast %c5_i32_152 : i32 to vector<1x128xi32>
    %568 = arith.cmpi eq, %539, %567 : vector<1x128xi32>
    %569 = vector.extract_strided_slice %549 {offsets = [5, 0], sizes = [1, 128], strides = [1, 1]} : vector<6x128xi32> to vector<1x128xi32>
    %570 = arith.select %568, %569, %566 : vector<1x128xi1>, vector<1x128xi32>
    %c2_153 = arith.constant 2 : index
    %c0_154 = arith.constant 0 : index
    %571 = vector.load %arg5[%c2_153, %c0_154] : memref<8x128xi32, #tpu.memory_space<vmem>>, vector<1x128xi32>
    tpu.vector_store %arg5[%c2_153, %c0_154], %570 {strides = array<i32>} : memref<8x128xi32, #tpu.memory_space<vmem>>, vector<1x128xi32>,
    %c1_155 = arith.constant 1 : index
    %c0_156 = arith.constant 0 : index
    %c0_157 = arith.constant 0 : index
    %572 = vector.load %arg6[%c1_155, %c0_156, %c0_157] : memref<8x6x128xi32, #tpu.memory_space<vmem>>, vector<1x6x128xi32>
    %573 = vector.shape_cast %572 : vector<1x6x128xi32> to vector<6x128xi32>
    %c1_i32_158 = arith.constant 1 : i32
    %574 = vector.broadcast %c1_i32_158 : i32 to vector<1x128xi32>
    %575 = arith.cmpi eq, %2, %574 : vector<1x128xi32>
    %576 = vector.shape_cast %575 : vector<1x128xi1> to vector<1x128xi1>
    %577 = vector.broadcast %576 : vector<1x128xi1> to vector<6x128xi1>
    %578 = vector.shape_cast %415 : vector<1x128xi32> to vector<1x128xi32>
    %579 = vector.broadcast %578 : vector<1x128xi32> to vector<6x128xi32>
    %580 = arith.select %577, %579, %573 : vector<6x128xi1>, vector<6x128xi32>
    %581 = vector.extract_strided_slice %580 {offsets = [0, 0], sizes = [1, 128], strides = [1, 1]} : vector<6x128xi32> to vector<1x128xi32>
    %c1_i32_159 = arith.constant 1 : i32
    %582 = vector.broadcast %c1_i32_159 : i32 to vector<1x128xi32>
    %583 = arith.cmpi eq, %570, %582 : vector<1x128xi32>
    %584 = vector.extract_strided_slice %580 {offsets = [1, 0], sizes = [1, 128], strides = [1, 1]} : vector<6x128xi32> to vector<1x128xi32>
    %585 = arith.select %583, %584, %581 : vector<1x128xi1>, vector<1x128xi32>
    %c2_i32_160 = arith.constant 2 : i32
    %586 = vector.broadcast %c2_i32_160 : i32 to vector<1x128xi32>
    %587 = arith.cmpi eq, %570, %586 : vector<1x128xi32>
    %588 = vector.extract_strided_slice %580 {offsets = [2, 0], sizes = [1, 128], strides = [1, 1]} : vector<6x128xi32> to vector<1x128xi32>
    %589 = arith.select %587, %588, %585 : vector<1x128xi1>, vector<1x128xi32>
    %c3_i32_161 = arith.constant 3 : i32
    %590 = vector.broadcast %c3_i32_161 : i32 to vector<1x128xi32>
    %591 = arith.cmpi eq, %570, %590 : vector<1x128xi32>
    %592 = vector.extract_strided_slice %580 {offsets = [3, 0], sizes = [1, 128], strides = [1, 1]} : vector<6x128xi32> to vector<1x128xi32>
    %593 = arith.select %591, %592, %589 : vector<1x128xi1>, vector<1x128xi32>
    %c4_i32_162 = arith.constant 4 : i32
    %594 = vector.broadcast %c4_i32_162 : i32 to vector<1x128xi32>
    %595 = arith.cmpi eq, %570, %594 : vector<1x128xi32>
    %596 = vector.extract_strided_slice %580 {offsets = [4, 0], sizes = [1, 128], strides = [1, 1]} : vector<6x128xi32> to vector<1x128xi32>
    %597 = arith.select %595, %596, %593 : vector<1x128xi1>, vector<1x128xi32>
    %c5_i32_163 = arith.constant 5 : i32
    %598 = vector.broadcast %c5_i32_163 : i32 to vector<1x128xi32>
    %599 = arith.cmpi eq, %570, %598 : vector<1x128xi32>
    %600 = vector.extract_strided_slice %580 {offsets = [5, 0], sizes = [1, 128], strides = [1, 1]} : vector<6x128xi32> to vector<1x128xi32>
    %601 = arith.select %599, %600, %597 : vector<1x128xi1>, vector<1x128xi32>
    %c1_164 = arith.constant 1 : index
    %c0_165 = arith.constant 0 : index
    %602 = vector.load %arg5[%c1_164, %c0_165] : memref<8x128xi32, #tpu.memory_space<vmem>>, vector<1x128xi32>
    tpu.vector_store %arg5[%c1_164, %c0_165], %601 {strides = array<i32>} : memref<8x128xi32, #tpu.memory_space<vmem>>, vector<1x128xi32>,
    %c0_166 = arith.constant 0 : index
    %c0_167 = arith.constant 0 : index
    %c0_168 = arith.constant 0 : index
    %603 = vector.load %arg6[%c0_166, %c0_167, %c0_168] : memref<8x6x128xi32, #tpu.memory_space<vmem>>, vector<1x6x128xi32>
    %604 = vector.shape_cast %603 : vector<1x6x128xi32> to vector<6x128xi32>
    %c0_i32_169 = arith.constant 0 : i32
    %605 = vector.broadcast %c0_i32_169 : i32 to vector<1x128xi32>
    %606 = arith.cmpi eq, %2, %605 : vector<1x128xi32>
    %607 = vector.shape_cast %606 : vector<1x128xi1> to vector<1x128xi1>
    %608 = vector.broadcast %607 : vector<1x128xi1> to vector<6x128xi1>
    %609 = vector.shape_cast %415 : vector<1x128xi32> to vector<1x128xi32>
    %610 = vector.broadcast %609 : vector<1x128xi32> to vector<6x128xi32>
    %611 = arith.select %608, %610, %604 : vector<6x128xi1>, vector<6x128xi32>
    %612 = vector.extract_strided_slice %611 {offsets = [0, 0], sizes = [1, 128], strides = [1, 1]} : vector<6x128xi32> to vector<1x128xi32>
    %c1_i32_170 = arith.constant 1 : i32
    %613 = vector.broadcast %c1_i32_170 : i32 to vector<1x128xi32>
    %614 = arith.cmpi eq, %601, %613 : vector<1x128xi32>
    %615 = vector.extract_strided_slice %611 {offsets = [1, 0], sizes = [1, 128], strides = [1, 1]} : vector<6x128xi32> to vector<1x128xi32>
    %616 = arith.select %614, %615, %612 : vector<1x128xi1>, vector<1x128xi32>
    %c2_i32_171 = arith.constant 2 : i32
    %617 = vector.broadcast %c2_i32_171 : i32 to vector<1x128xi32>
    %618 = arith.cmpi eq, %601, %617 : vector<1x128xi32>
    %619 = vector.extract_strided_slice %611 {offsets = [2, 0], sizes = [1, 128], strides = [1, 1]} : vector<6x128xi32> to vector<1x128xi32>
    %620 = arith.select %618, %619, %616 : vector<1x128xi1>, vector<1x128xi32>
    %c3_i32_172 = arith.constant 3 : i32
    %621 = vector.broadcast %c3_i32_172 : i32 to vector<1x128xi32>
    %622 = arith.cmpi eq, %601, %621 : vector<1x128xi32>
    %623 = vector.extract_strided_slice %611 {offsets = [3, 0], sizes = [1, 128], strides = [1, 1]} : vector<6x128xi32> to vector<1x128xi32>
    %624 = arith.select %622, %623, %620 : vector<1x128xi1>, vector<1x128xi32>
    %c4_i32_173 = arith.constant 4 : i32
    %625 = vector.broadcast %c4_i32_173 : i32 to vector<1x128xi32>
    %626 = arith.cmpi eq, %601, %625 : vector<1x128xi32>
    %627 = vector.extract_strided_slice %611 {offsets = [4, 0], sizes = [1, 128], strides = [1, 1]} : vector<6x128xi32> to vector<1x128xi32>
    %628 = arith.select %626, %627, %624 : vector<1x128xi1>, vector<1x128xi32>
    %c5_i32_174 = arith.constant 5 : i32
    %629 = vector.broadcast %c5_i32_174 : i32 to vector<1x128xi32>
    %630 = arith.cmpi eq, %601, %629 : vector<1x128xi32>
    %631 = vector.extract_strided_slice %611 {offsets = [5, 0], sizes = [1, 128], strides = [1, 1]} : vector<6x128xi32> to vector<1x128xi32>
    %632 = arith.select %630, %631, %628 : vector<1x128xi1>, vector<1x128xi32>
    %c0_175 = arith.constant 0 : index
    %c0_176 = arith.constant 0 : index
    %633 = vector.load %arg5[%c0_175, %c0_176] : memref<8x128xi32, #tpu.memory_space<vmem>>, vector<1x128xi32>
    tpu.vector_store %arg5[%c0_175, %c0_176], %632 {strides = array<i32>} : memref<8x128xi32, #tpu.memory_space<vmem>>, vector<1x128xi32>,
    return
  }
  func.func @transform_0(%arg0: i32) -> (i32, i32, i32) {
    %c0_i32 = arith.constant 0 : i32
    %c0_i32_0 = arith.constant 0 : i32
    %c0_i32_1 = arith.constant 0 : i32
    return %c0_i32, %c0_i32_0, %arg0 : i32, i32, i32
  }
  func.func @transform_1(%arg0: i32) -> (i32, i32) {
    %c0_i32 = arith.constant 0 : i32
    %c0_i32_0 = arith.constant 0 : i32
    return %c0_i32, %arg0 : i32, i32
  }
  func.func @transform_2(%arg0: i32) -> (i32, i32) {
    %c0_i32 = arith.constant 0 : i32
    %c0_i32_0 = arith.constant 0 : i32
    %c0_i32_1 = arith.constant 0 : i32
    return %c0_i32, %c0_i32_0 : i32, i32
  }
  func.func @transform_3(%arg0: i32) -> (i32, i32) {
    %c0_i32 = arith.constant 0 : i32
    %c0_i32_0 = arith.constant 0 : i32
    %c0_i32_1 = arith.constant 0 : i32
    return %c0_i32, %c0_i32_0 : i32, i32
  }
  func.func @transform_4(%arg0: i32) -> (i32, i32) {
    %c0_i32 = arith.constant 0 : i32
    %c0_i32_0 = arith.constant 0 : i32
    return %c0_i32, %arg0 : i32, i32
  }
}

</mosaic_0001>

<bundles_post_ra>
// kernel: tpu_custom_call.1
= control target key start
LH: loop header
LB: loop body
LE: loop exit
PB: predicated region body
PF: predicated region fallthrough
CT: control target
= control target key end

     0   :  { %v565_v1 = vmov 4   ;;  %v566_v2 = vmov 1   ;;  %s831_s0 = inlined_call_operand.vmem [shape: f32[8,6,128], index: 0, kind: input, shape index: {}]   ;;  %s832_s1 = inlined_call_operand.vmem [shape: s32[1,128], index: 1, kind: input, shape index: {}]   ;;  %s833_s2 = inlined_call_operand.vmem [shape: f32[6,6], index: 2, kind: input, shape index: {}]   ;;  %s834_s3 = inlined_call_operand.vmem [shape: f32[6,1], index: 3, kind: input, shape index: {}]   ;;  %s835_s4 = inlined_call_operand.hbm [shape: s32[8,128], index: 4, kind: output, shape index: {}]  }
   0x1   :  { %v18_v0 = vld [vmem:[%s833_s2] sm:$0x3f]  ;;  %532 = vset.pattern.permute.xlu0 %v565_v1  ;;  %534 = vset.pattern.permute.xlu1 %v566_v2 }
   0x2   :  { %9 = vsyncpa [#allocation4], 0  ;;  %27 = vperm.xlu1 %534, %v18_v0   ;;  %39 = vperm.xlu0 %532, %v18_v0   ;;  %v567_v3 = vmov 3   ;;  %v568_v4 = vmov 2   ;;  %v569_v5 = vmov 0   ;;  %v570_v6 = vmov 5  }
   0x3   :  { %536 = vset.pattern.permute.xlu2 %v567_v3  ;;  %v19_v7 = vld [vmem:[%s834_s3] sm:$0x3f]  ;;  %v518_v39 = vld [vmem:[%s831_s0 + $0x8] sm:$0x3f]  ;;  %s509_s11 = sshll.u32 %s835_s4, 4  ;;  %s510_s11 = int_to_ptr.hbm [resolvable:$true] %s509_s11 }
   0x4   :  { %35 = vperm.xlu2 %536, %v18_v0   ;;  %v48_v8 = vld [vmem:[%s831_s0] sm:$0x3f] }
   0x5   :  { %v620_v13 = vld [vmem:[%s832_s1] sm:$0x1] }
   0x6   :  { %vm80_vm0 = vcmp.lt.s32.totalorder %v620_v13, 1  ;;  %vm86_vm2 = vcmp.eq.s32.totalorder %v620_v13, 1  ;;  %vm121_vm9 = vcmp.lt.s32.totalorder %v620_v13, 2  ;;  %vm128_vm11 = vcmp.eq.s32.totalorder %v620_v13, 2 }
   0x7   :  { %v81_v22 = vsel %vm80_vm0, 1, %v569_v5  ;;  %v87_v33 = vsel %vm86_vm2, 1, %v569_v5  ;;  %v122_v54 = vsel %vm121_vm9, 1, %v569_v5  ;;  %vm163_vm2 = vcmp.lt.s32.totalorder %v620_v13, 3 }
   0x8   :  { %v82_v30 = vperm.slane %v81_v22, 0  ;;  %v88_v38 = vperm.slane %v87_v33, 0  ;;  %v123_v61 = vperm.slane %v122_v54, 0 }
   0xa   :  { %535 = vset.pattern.permute.xlu1 %v568_v4  ;;  %533 = vset.pattern.permute.xlu0 %v569_v5  ;;  %vm83_vm6 = vcmp.eq.s32.totalorder %v82_v30, 1  ;;  %vm648_vm8 = vcmp.eq.s32.totalorder %v88_v38, 1  ;;  %vm124_vm15 = vcmp.eq.s32.totalorder %v123_v61, 1 }
   0xb   :  { %31 = vperm.xlu1 %535, %v18_v0   ;;  %23 = vperm.xlu0 %533, %v18_v0  }
   0xc   :  { %537 = vset.pattern.permute.xlu2 %v570_v6 }
   0xd   :  { %43 = vperm.xlu2 %537, %v18_v0   ;;  %v129_v0 = vsel %vm128_vm11, 1, %v569_v5 }
   0xe   :  { %v130_v6 = vperm.slane %v129_v0, 0 }
  0x13   :  { %538 = vset.pattern.permute.xlu1 %v569_v5 }
  0x14   :  { %347 = vperm.xlu1 %538, %v19_v7   ;;  %v519_v7 = vld [vmem:[%s831_s0 + $0x10] sm:$0x3f] }
  0x5e   :  { %v615_v12 = vpop.permute.xlu2 %35 }
  0x67   :  { %v640_v29 = vpop.permute.xlu2 %43 }
  0x74   :  { %v608_v9 = vpop.permute.xlu0 %39  ;;  %v610_v10 = vpop.permute.xlu1 %27 }
  0x75   :  { %v613_v11 = vadd.f32 %v48_v8, %v608_v9 }
  0x77   :  { %v54_v14 = vperm.slane %v613_v11, 1  ;;  %v52_v15 = vperm.slane %v613_v11, 0  ;;  %v59_v19 = vperm.slane %v613_v11, 2  ;;  %v64_v20 = vperm.slane %v613_v11, 3 }
  0x78   :  { %v69_v23 = vperm.slane %v613_v11, 4  ;;  %v74_v27 = vperm.slane %v613_v11, 5 }
  0x79   :  { %v55_v18 = vadd.f32 %v54_v14, %v610_v10  ;;  %v65_v28 = vadd.f32 %v64_v20, %v615_v12 }
  0x7a   :  { %v70_v34 = vadd.f32 %v69_v23, %v608_v9  ;;  %v75_v37 = vadd.f32 %v74_v27, %v640_v29 }
  0x7d   :  { %v625_v16 = vpop.permute.xlu1 %31  ;;  %v627_v17 = vpop.permute.xlu0 %23 }
  0x7e   :  { %v53_v21 = vadd.f32 %v52_v15, %v627_v17  ;;  %v60_v24 = vadd.f32 %v59_v19, %v625_v16 }
  0x80   :  { %vm56_vm1 = vcmp.gt.f32.partialorder %v55_v18, %v53_v21 }
  0x81   :  { %v57_v25 = vsel %vm56_vm1, %v55_v18, %v53_v21  ;;  %v58_v26 = vsel %vm56_vm1, 1, %v569_v5  ;;  %vm669_vm1 = vcmp.eq.s32.totalorder %v130_v6, 1 }
  0x82   :  { %vm61_vm3 = vcmp.gt.f32.partialorder %v60_v24, %v57_v25 }
  0x83   :  { %v62_v31 = vsel %vm61_vm3, %v60_v24, %v57_v25  ;;  %v63_v32 = vsel %vm61_vm3, 2, %v58_v26 }
  0x84   :  { %vm66_vm4 = vcmp.gt.f32.partialorder %v65_v28, %v62_v31 }
  0x85   :  { %v67_v35 = vsel %vm66_vm4, %v65_v28, %v62_v31  ;;  %v68_v36 = vsel %vm66_vm4, 3, %v63_v32  ;;  %v164_v28 = vsel %vm163_vm2, 1, %v569_v5  ;;  %vm247_vm2 = vcmp.lt.s32.totalorder %v620_v13, 5 }
  0x86   :  { %vm71_vm5 = vcmp.gt.f32.partialorder %v70_v34, %v67_v35 }
  0x87   :  { %v72_v40 = vsel %vm71_vm5, %v70_v34, %v67_v35  ;;  %v73_v41 = vsel %vm71_vm5, 4, %v68_v36  ;;  %v165_v36 = vperm.slane %v164_v28, 0 }
  0x88   :  { %vm76_vm7 = vcmp.gt.f32.partialorder %v75_v37, %v72_v40 }
  0x89   :  { %v77_v42 = vsel %vm76_vm7, %v75_v37, %v72_v40  ;;  %v78_v43 = vsel %vm76_vm7, 5, %v73_v41  ;;  %vm166_vm7 = vcmp.eq.s32.totalorder %v165_v36, 1 }
  0x8a   :  { %v79_v44 = vadd.f32 %v518_v39, %v77_v42  ;;  %v84_v45 = vsel %vm83_vm6, 0, %v78_v43  ;;  %v520_v43 = vld [vmem:[%s831_s0 + $0x18] sm:$0x3f] }
  0x8b   :  { %85 = vst [vmem:[#allocation2 + $0x30] sm:$0x3f] %v84_v45 }
  0x8c   :  { %v93_v47 = vperm.slane %v79_v44, 0  ;;  %v95_v48 = vperm.slane %v79_v44, 1  ;;  %v100_v49 = vperm.slane %v79_v44, 2  ;;  %v90_v50 = vsel %vm648_vm8, %v79_v44, %v613_v11 }
  0x8d   :  { %v105_v53 = vperm.slane %v79_v44, 3  ;;  %v110_v56 = vperm.slane %v79_v44, 4  ;;  %v115_v60 = vperm.slane %v79_v44, 5 }
  0x8e   :  { %v94_v51 = vadd.f32 %v93_v47, %v627_v17  ;;  %v96_v52 = vadd.f32 %v95_v48, %v610_v10  ;;  %v101_v55 = vadd.f32 %v100_v49, %v625_v16 }
  0x8f   :  { %v106_v59 = vadd.f32 %v105_v53, %v615_v12  ;;  %v111_v1 = vadd.f32 %v110_v56, %v608_v9  ;;  %v116_v4 = vadd.f32 %v115_v60, %v640_v29 }
  0x90   :  { %vm97_vm10 = vcmp.gt.f32.partialorder %v96_v52, %v94_v51 }
  0x91   :  { %v98_v57 = vsel %vm97_vm10, %v96_v52, %v94_v51  ;;  %v99_v58 = vsel %vm97_vm10, 1, %v569_v5  ;;  %vm205_vm10 = vcmp.lt.s32.totalorder %v620_v13, 4 }
  0x92   :  { %vm102_vm12 = vcmp.gt.f32.partialorder %v101_v55, %v98_v57 }
  0x93   :  { %v103_v62 = vsel %vm102_vm12, %v101_v55, %v98_v57  ;;  %v104_v63 = vsel %vm102_vm12, 2, %v99_v58  ;;  %v206_v57 = vsel %vm205_vm10, 1, %v569_v5  ;;  %vm289_vm10 = vcmp.lt.s32.totalorder %v620_v13, 6 }
  0x94   :  { %vm107_vm13 = vcmp.gt.f32.partialorder %v106_v59, %v103_v62  ;;  %v207_v0 = vperm.slane %v206_v57, 0 }
  0x95   :  { %v108_v2 = vsel %vm107_vm13, %v106_v59, %v103_v62  ;;  %v109_v3 = vsel %vm107_vm13, 3, %v104_v63 }
  0x96   :  { %vm112_vm14 = vcmp.gt.f32.partialorder %v111_v1, %v108_v2 }
  0x97   :  { %v113_v8 = vsel %vm112_vm14, %v111_v1, %v108_v2  ;;  %v114_v11 = vsel %vm112_vm14, 4, %v109_v3 }
  0x98   :  { %vm117_vm0 = vcmp.gt.f32.partialorder %v116_v4, %v113_v8 }
  0x99   :  { %v118_v14 = vsel %vm117_vm0, %v116_v4, %v113_v8  ;;  %v119_v15 = vsel %vm117_vm0, 5, %v114_v11  ;;  %v521_v8 = vld [vmem:[%s831_s0 + $0x20] sm:$0x3f] }
  0x9a   :  { %v120_v18 = vadd.f32 %v519_v7, %v118_v14  ;;  %v125_v19 = vsel %vm124_vm15, 0, %v119_v15  ;;  %vm208_vm15 = vcmp.eq.s32.totalorder %v207_v0, 1 }
  0x9b   :  { %127 = vst [vmem:[#allocation2] sm:$0x3f] %v125_v19 }
  0x9c   :  { %v135_v21 = vperm.slane %v120_v18, 0  ;;  %v137_v22 = vperm.slane %v120_v18, 1  ;;  %v142_v23 = vperm.slane %v120_v18, 2  ;;  %v676_v24 = vsel %vm669_vm1, %v120_v18, %v90_v50 }
  0x9d   :  { %v147_v27 = vperm.slane %v120_v18, 3  ;;  %v152_v31 = vperm.slane %v120_v18, 4  ;;  %v157_v35 = vperm.slane %v120_v18, 5 }
  0x9e   :  { %v136_v25 = vadd.f32 %v135_v21, %v627_v17  ;;  %v138_v26 = vadd.f32 %v137_v22, %v610_v10  ;;  %v143_v30 = vadd.f32 %v142_v23, %v625_v16 }
  0x9f   :  { %v148_v34 = vadd.f32 %v147_v27, %v615_v12  ;;  %v153_v39 = vadd.f32 %v152_v31, %v608_v9  ;;  %v158_v42 = vadd.f32 %v157_v35, %v640_v29 }
  0xa0   :  { %vm139_vm3 = vcmp.gt.f32.partialorder %v138_v26, %v136_v25 }
  0xa1   :  { %v140_v32 = vsel %vm139_vm3, %v138_v26, %v136_v25  ;;  %v141_v33 = vsel %vm139_vm3, 1, %v569_v5 }
  0xa2   :  { %vm144_vm4 = vcmp.gt.f32.partialorder %v143_v30, %v140_v32 }
  0xa3   :  { %v145_v37 = vsel %vm144_vm4, %v143_v30, %v140_v32  ;;  %v146_v38 = vsel %vm144_vm4, 2, %v141_v33  ;;  %v248_v30 = vsel %vm247_vm2, 1, %v569_v5  ;;  %vm170_vm2 = vcmp.eq.s32.totalorder %v620_v13, 3 }
  0xa4   :  { %vm149_vm5 = vcmp.gt.f32.partialorder %v148_v34, %v145_v37 }
  0xa5   :  { %v150_v40 = vsel %vm149_vm5, %v148_v34, %v145_v37  ;;  %v151_v41 = vsel %vm149_vm5, 3, %v146_v38  ;;  %v249_v37 = vperm.slane %v248_v30, 0 }
  0xa6   :  { %vm154_vm6 = vcmp.gt.f32.partialorder %v153_v39, %v150_v40 }
  0xa7   :  { %v155_v44 = vsel %vm154_vm6, %v153_v39, %v150_v40  ;;  %v156_v45 = vsel %vm154_vm6, 4, %v151_v41 }
  0xa8   :  { %vm159_vm9 = vcmp.gt.f32.partialorder %v158_v42, %v155_v44 }
  0xa9   :  { %v160_v47 = vsel %vm159_vm9, %v158_v42, %v155_v44  ;;  %v161_v48 = vsel %vm159_vm9, 5, %v156_v45  ;;  %v522_v44 = vld [vmem:[%s831_s0 + $0x28] sm:$0x3f] }
  0xaa   :  { %v689_v49 = vadd.f32 %v520_v43, %v160_v47  ;;  %v167_v50 = vsel %vm166_vm7, 0, %v161_v48  ;;  %vm250_vm7 = vcmp.eq.s32.totalorder %v249_v37, 1 }
  0xab   :  { %169 = vst [vmem:[#allocation2 + $0x18] sm:$0x3f] %v167_v50 }
  0xac   :  { %v177_v51 = vperm.slane %v689_v49, 0  ;;  %v179_v52 = vperm.slane %v689_v49, 1  ;;  %v184_v53 = vperm.slane %v689_v49, 2  ;;  %v189_v56 = vperm.slane %v689_v49, 3 }
  0xad   :  { %v194_v59 = vperm.slane %v689_v49, 4  ;;  %v199_v63 = vperm.slane %v689_v49, 5 }
  0xae   :  { %v178_v54 = vadd.f32 %v177_v51, %v627_v17  ;;  %v180_v55 = vadd.f32 %v179_v52, %v610_v10  ;;  %v185_v58 = vadd.f32 %v184_v53, %v625_v16  ;;  %v190_v62 = vadd.f32 %v189_v56, %v615_v12 }
  0xaf   :  { %v195_v3 = vadd.f32 %v194_v59, %v608_v9  ;;  %v200_v7 = vadd.f32 %v199_v63, %v640_v29  ;;  %v290_v59 = vsel %vm289_vm10, 1, %v569_v5 }
  0xb0   :  { %vm181_vm11 = vcmp.gt.f32.partialorder %v180_v55, %v178_v54 }
  0xb1   :  { %v182_v60 = vsel %vm181_vm11, %v180_v55, %v178_v54  ;;  %v183_v61 = vsel %vm181_vm11, 1, %v569_v5 }
  0xb2   :  { %vm186_vm12 = vcmp.gt.f32.partialorder %v185_v58, %v182_v60 }
  0xb3   :  { %v187_v1 = vsel %vm186_vm12, %v185_v58, %v182_v60  ;;  %v188_v2 = vsel %vm186_vm12, 2, %v183_v61 }
  0xb4   :  { %vm191_vm13 = vcmp.gt.f32.partialorder %v190_v62, %v187_v1 }
  0xb5   :  { %v192_v4 = vsel %vm191_vm13, %v190_v62, %v187_v1  ;;  %v193_v6 = vsel %vm191_vm13, 3, %v188_v2  ;;  %v291_v2 = vperm.slane %v290_v59, 0 }
  0xb6   :  { %vm196_vm14 = vcmp.gt.f32.partialorder %v195_v3, %v192_v4 }
  0xb7   :  { %v197_v11 = vsel %vm196_vm14, %v195_v3, %v192_v4  ;;  %v198_v14 = vsel %vm196_vm14, 4, %v193_v6 }
  0xb8   :  { %vm201_vm0 = vcmp.gt.f32.partialorder %v200_v7, %v197_v11 }
  0xb9   :  { %v202_v15 = vsel %vm201_vm0, %v200_v7, %v197_v11  ;;  %v203_v18 = vsel %vm201_vm0, 5, %v198_v14  ;;  %v523_v14 = vld [vmem:[%s831_s0 + $0x30] sm:$0x3f] }
  0xba   :  { %v709_v19 = vadd.f32 %v521_v8, %v202_v15  ;;  %v209_v21 = vsel %vm208_vm15, 0, %v203_v18  ;;  %vm292_vm15 = vcmp.eq.s32.totalorder %v291_v2, 1 }
  0xbb   :  { %211 = vst [vmem:[#allocation2 + $0x10] sm:$0x3f] %v209_v21 }
  0xbc   :  { %v219_v22 = vperm.slane %v709_v19, 0  ;;  %v221_v23 = vperm.slane %v709_v19, 1  ;;  %v226_v25 = vperm.slane %v709_v19, 2  ;;  %v231_v28 = vperm.slane %v709_v19, 3 }
  0xbd   :  { %v236_v32 = vperm.slane %v709_v19, 4  ;;  %v241_v36 = vperm.slane %v709_v19, 5 }
  0xbe   :  { %v220_v26 = vadd.f32 %v219_v22, %v627_v17  ;;  %v222_v27 = vadd.f32 %v221_v23, %v610_v10  ;;  %v227_v31 = vadd.f32 %v226_v25, %v625_v16  ;;  %v232_v35 = vadd.f32 %v231_v28, %v615_v12 }
  0xbf   :  { %v237_v40 = vadd.f32 %v236_v32, %v608_v9  ;;  %v242_v43 = vadd.f32 %v241_v36, %v640_v29 }
  0xc0   :  { %vm223_vm3 = vcmp.gt.f32.partialorder %v222_v27, %v220_v26 }
  0xc1   :  { %v224_v33 = vsel %vm223_vm3, %v222_v27, %v220_v26  ;;  %v225_v34 = vsel %vm223_vm3, 1, %v569_v5  ;;  %vm212_vm3 = vcmp.eq.s32.totalorder %v620_v13, 4  ;;  %v171_v26 = vsel %vm170_vm2, 1, %v569_v5 }
  0xc2   :  { %vm228_vm4 = vcmp.gt.f32.partialorder %v227_v31, %v224_v33 }
  0xc3   :  { %v229_v38 = vsel %vm228_vm4, %v227_v31, %v224_v33  ;;  %v230_v39 = vsel %vm228_vm4, 2, %v225_v34  ;;  %vm254_vm4 = vcmp.eq.s32.totalorder %v620_v13, 5  ;;  %v213_v31 = vsel %vm212_vm3, 1, %v569_v5 }
  0xc4   :  { %vm233_vm5 = vcmp.gt.f32.partialorder %v232_v35, %v229_v38  ;;  %v255_v36 = vsel %vm254_vm4, 1, %v569_v5 }
  0xc5   :  { %v234_v41 = vsel %vm233_vm5, %v232_v35, %v229_v38  ;;  %v235_v42 = vsel %vm233_vm5, 3, %v230_v39  ;;  %vm331_vm5 = vcmp.lt.s32.totalorder %v620_v13, 7  ;;  %v172_v35 = vperm.slane %v171_v26, 0 }
  0xc6   :  { %vm238_vm6 = vcmp.gt.f32.partialorder %v237_v40, %v234_v41  ;;  %v332_v37 = vsel %vm331_vm5, 1, %v569_v5  ;;  %vm351_vm5 = vcmask 1045504  }
  0xc7   :  { %v239_v45 = vsel %vm238_vm6, %v237_v40, %v234_v41  ;;  %v240_v47 = vsel %vm238_vm6, 4, %v235_v42  ;;  %vm296_vm6 = vcmp.eq.s32.totalorder %v620_v13, 6  ;;  %v214_v40 = vperm.slane %v213_v31, 0 }
  0xc8   :  { %vm243_vm9 = vcmp.gt.f32.partialorder %v242_v43, %v239_v45  ;;  %v297_v41 = vsel %vm296_vm6, 1, %v569_v5 }
  0xc9   :  { %v244_v48 = vsel %vm243_vm9, %v242_v43, %v239_v45  ;;  %v245_v50 = vsel %vm243_vm9, 5, %v240_v47  ;;  %v256_v45 = vperm.slane %v255_v36, 0  ;;  %v333_v47 = vperm.slane %v332_v37, 0 }
  0xca   :  { %v729_v51 = vadd.f32 %v522_v44, %v244_v48  ;;  %v251_v52 = vsel %vm250_vm7, 0, %v245_v50  ;;  %vm338_vm7 = vcmp.eq.s32.totalorder %v620_v13, 7 }
  0xcb   :  { %253 = vst [vmem:[#allocation2 + $0x8] sm:$0x3f] %v251_v52  ;;  %v339_v42 = vsel %vm338_vm7, 1, %v569_v5  ;;  %v298_v52 = vperm.slane %v297_v41, 0 }
  0xcc   :  { %v261_v53 = vperm.slane %v729_v51, 0  ;;  %v263_v54 = vperm.slane %v729_v51, 1  ;;  %v268_v55 = vperm.slane %v729_v51, 2  ;;  %v273_v58 = vperm.slane %v729_v51, 3 }
  0xcd   :  { %v278_v61 = vperm.slane %v729_v51, 4  ;;  %v283_v1 = vperm.slane %v729_v51, 5  ;;  %vm783_vm2 = vcmp.eq.s32.totalorder %v298_v52, 1 }
  0xce   :  { %v262_v56 = vadd.f32 %v261_v53, %v627_v17  ;;  %v264_v57 = vadd.f32 %v263_v54, %v610_v10  ;;  %v269_v60 = vadd.f32 %v268_v55, %v625_v16  ;;  %v274_v0 = vadd.f32 %v273_v58, %v615_v12 }
  0xcf   :  { %v279_v6 = vadd.f32 %v278_v61, %v608_v9  ;;  %v284_v11 = vadd.f32 %v283_v1, %v640_v29  ;;  %v340_v54 = vperm.slane %v339_v42, 0  ;;  %v348_v1 = vpop.permute.xlu1 %347 }
  0xd0   :  { %vm265_vm11 = vcmp.gt.f32.partialorder %v264_v57, %v262_v56 }
  0xd1   :  { %v266_v62 = vsel %vm265_vm11, %v264_v57, %v262_v56  ;;  %v267_v63 = vsel %vm265_vm11, 1, %v569_v5  ;;  %vm341_vm4 = vcmp.eq.s32.totalorder %v340_v54, 1 }
  0xd2   :  { %vm270_vm12 = vcmp.gt.f32.partialorder %v269_v60, %v266_v62  ;;  %v408_v52 = vld [vmem:[#allocation2 + $0x8] sm:$0x3f] }
  0xd3   :  { %v271_v3 = vsel %vm270_vm12, %v269_v60, %v266_v62  ;;  %v272_v4 = vsel %vm270_vm12, 2, %v267_v63  ;;  %vm767_vm12 = vcmp.eq.s32.totalorder %v172_v35, 1 }
  0xd4   :  { %vm275_vm13 = vcmp.gt.f32.partialorder %v274_v0, %v271_v3 }
  0xd5   :  { %v276_v7 = vsel %vm275_vm13, %v274_v0, %v271_v3  ;;  %v277_v8 = vsel %vm275_vm13, 3, %v272_v4  ;;  %vm771_vm13 = vcmp.eq.s32.totalorder %v214_v40, 1 }
  0xd6   :  { %vm280_vm14 = vcmp.gt.f32.partialorder %v279_v6, %v276_v7 }
  0xd7   :  { %v281_v15 = vsel %vm280_vm14, %v279_v6, %v276_v7  ;;  %v282_v18 = vsel %vm280_vm14, 4, %v277_v8 }
  0xd8   :  { %vm285_vm0 = vcmp.gt.f32.partialorder %v284_v11, %v281_v15 }
  0xd9   :  { %v286_v21 = vsel %vm285_vm0, %v284_v11, %v281_v15  ;;  %v287_v22 = vsel %vm285_vm0, 5, %v282_v18  ;;  %vm334_vm0 = vcmp.eq.s32.totalorder %v333_v47, 1 }
  0xda   :  { %v288_v23 = vadd.f32 %v523_v14, %v286_v21  ;;  %v293_v25 = vsel %vm292_vm15, 0, %v287_v22  ;;  %vm776_vm15 = vcmp.eq.s32.totalorder %v256_v45, 1  ;;  %v46_v14 = vlaneseq }
  0xdb   :  { %295 = vst [vmem:[#allocation2 + $0x20] sm:$0x3f] %v293_v25 }
  0xdc   :  { %v303_v27 = vperm.slane %v288_v23, 0  ;;  %v305_v28 = vperm.slane %v288_v23, 1  ;;  %v310_v30 = vperm.slane %v288_v23, 2  ;;  %v315_v34 = vperm.slane %v288_v23, 3 }
  0xdd   :  { %v320_v39 = vperm.slane %v288_v23, 4  ;;  %v325_v44 = vperm.slane %v288_v23, 5  ;;  %v47_v21 = vshrl.u32 %v46_v14, 7 }
  0xde   :  { %v304_v32 = vadd.f32 %v303_v27, %v627_v17  ;;  %v306_v33 = vadd.f32 %v305_v28, %v610_v10  ;;  %v311_v38 = vadd.f32 %v310_v30, %v625_v16  ;;  %v316_v43 = vadd.f32 %v315_v34, %v615_v12 }
  0xdf   :  { %v321_v16 = vadd.f32 %v320_v39, %v608_v9  ;;  %v326_v12 = vadd.f32 %v325_v44, %v640_v29  ;;  %v524_v9 = vld [vmem:[%s831_s0 + $0x38] sm:$0x3f]  ;;  %v174_v29 = vsel %vm767_vm12, %v689_v49, %v676_v24  ;;  %s571_s0 = smov [#allocation3]  }
  0xe0   :  { %vm307_vm9 = vcmp.gt.f32.partialorder %v306_v33, %v304_v32  ;;  %v216_v62 = vsel %vm771_vm13, %v709_v19, %v174_v29  ;;  %s507_s8 = sshll.u32 %s571_s0, 4  ;;  %s508_s8 = int_to_ptr.vmem [resolvable:$true] %s507_s8 }
  0xe1   :  { %v308_v17 = vsel %vm307_vm9, %v306_v33, %v304_v32  ;;  %v309_v10 = vsel %vm307_vm9, 1, %v569_v5  ;;  %v258_v2 = vsel %vm776_vm15, %v729_v51, %v216_v62  ;;  %v426_v62 = vld [vmem:[#allocation2 + $0x10] sm:$0x3f] }
  0xe2   :  { %vm312_vm10 = vcmp.gt.f32.partialorder %v311_v38, %v308_v17  ;;  %v300_v6 = vsel %vm783_vm2, %v288_v23, %v258_v2  ;;  %v390_v41 = vld [vmem:[#allocation2 + $0x20] sm:$0x3f] }
  0xe3   :  { %v313_v48 = vsel %vm312_vm10, %v311_v38, %v308_v17  ;;  %v314_v50 = vsel %vm312_vm10, 2, %v309_v10 }
  0xe4   :  { %vm317_vm11 = vcmp.gt.f32.partialorder %v316_v43, %v313_v48 }
  0xe5   :  { %v318_v55 = vsel %vm317_vm11, %v316_v43, %v313_v48  ;;  %v319_v56 = vsel %vm317_vm11, 3, %v314_v50 }
  0xe6   :  { %vm322_vm14 = vcmp.gt.f32.partialorder %v321_v16, %v318_v55 }
  0xe7   :  { %v323_v59 = vsel %vm322_vm14, %v321_v16, %v318_v55  ;;  %v324_v60 = vsel %vm322_vm14, 4, %v319_v56 }
  0xe8   :  { %vm327_vm3 = vcmp.gt.f32.partialorder %v326_v12, %v323_v59 }
  0xe9   :  { %v328_v63 = vsel %vm327_vm3, %v326_v12, %v323_v59  ;;  %v329_v0 = vsel %vm327_vm3, 5, %v324_v60 }
  0xea   :  { %v330_v3 = vadd.f32 %v524_v9, %v328_v63  ;;  %v335_v4 = vsel %vm334_vm0, 0, %v329_v0 }
  0xeb   :  { %337 = vst [vmem:[#allocation2 + $0x28] sm:$0x3f] %v335_v4 }
  0xec   :  { %v342_v24 = vsel %vm341_vm4, %v330_v3, %v300_v6 }
  0xed   :  { %v350_v49 = vadd.f32 %v348_v1, %v342_v24 }
  0xef   :  { %v352_v7 = vsel %vm351_vm5, %v350_v49, -inf }
  0xf0   :  { %v353_v8 = vrot.slane %v352_v7, 4 }
  0xf2   :  { %v354_v11 = vmax.f32 %v352_v7, %v353_v8  ;;  %v372_v32 = vld [vmem:[#allocation2 + $0x28] sm:$0x3f]  ;;  %v444_v8 = vld [vmem:[#allocation2 + $0x18] sm:$0x3f] }
  0xf4   :  { %v355_v19 = vrot.slane %v354_v11, 2 }
  0xf6   :  { %v356_v15 = vmax.f32 %v354_v11, %v355_v19 }
  0xf8   :  { %v357_v18 = vrot.slane %v356_v15, 1 }
  0xfa   :  { %v358_v22 = vmax.f32 %v356_v15, %v357_v18 }
  0xfc   :  { %vm359_vm6 = vcmp.eq.f32.partialorder %v350_v49, %v358_v22 }
  0xfd   :  { %v360_v51 = vsel %vm359_vm6, %v47_v21, 6 }
  0xfe   :  { %v361_v25 = vsel %vm351_vm5, %v360_v51, 2147483647 }
  0xff   :  { %v362_v26 = vrot.slane %v361_v25, 4 }
 0x101   :  { %vm363_vm7 = vcmp.lt.s32.totalorder %v361_v25, %v362_v26 }
 0x102   :  { %v364_v27 = vsel %vm363_vm7, %v361_v25, %v362_v26 }
 0x103   :  { %v365_v23 = vrot.slane %v364_v27, 2 }
 0x105   :  { %vm366_vm9 = vcmp.lt.s32.totalorder %v364_v27, %v365_v23 }
 0x106   :  { %v367_v28 = vsel %vm366_vm9, %v364_v27, %v365_v23  ;;  %v462_v27 = vld [vmem:[#allocation2] sm:$0x3f] }
 0x107   :  { %v368_v30 = vrot.slane %v367_v28, 1 }
 0x109   :  { %vm369_vm10 = vcmp.lt.s32.totalorder %v367_v28, %v368_v30 }
 0x10a   :  { %v799_v31 = vsel %vm369_vm10, %v367_v28, %v368_v30 }
 0x10b   :  { %v373_v33 = vsel %vm783_vm2, %v799_v31, %v372_v32  ;;  %371 = vst [vmem:[#allocation3 + $0x7] sm:$0x1] %v799_v31  ;;  %vm374_vm11 = vcmp.eq.s32.totalorder %v799_v31, 1  ;;  %vm377_vm14 = vcmp.eq.s32.totalorder %v799_v31, 2  ;;  %vm380_vm0 = vcmp.eq.s32.totalorder %v799_v31, 3 }
 0x10c   :  { %v375_v34 = vrot.slane %v373_v33, 7  ;;  %vm383_vm3 = vcmp.eq.s32.totalorder %v799_v31, 4  ;;  %v391_v10 = vsel %vm776_vm15, %v799_v31, %v390_v41  ;;  %vm386_vm2 = vcmp.eq.s32.totalorder %v799_v31, 5 }
 0x10d   :  { %v393_v44 = vrot.slane %v391_v10, 4  ;;  %v394_v45 = vrot.slane %v391_v10, 3  ;;  %v397_v47 = vrot.slane %v391_v10, 5  ;;  %v400_v50 = vrot.slane %v391_v10, 6 }
 0x10e   :  { %v376_v35 = vsel %vm374_vm11, %v373_v33, %v375_v34  ;;  %v403_v54 = vrot.slane %v391_v10, 7  ;;  %v409_v55 = vsel %vm771_vm13, %v799_v31, %v408_v52  ;;  %v427_v57 = vsel %vm767_vm12, %v799_v31, %v426_v62 }
 0x10f   :  { %v378_v36 = vrot.slane %v376_v35, 7  ;;  %v411_v9 = vrot.slane %v409_v55, 4  ;;  %v412_v59 = vrot.slane %v409_v55, 3  ;;  %v415_v60 = vrot.slane %v409_v55, 5 }
 0x110   :  { %v418_v29 = vrot.slane %v409_v55, 6  ;;  %v421_v0 = vrot.slane %v409_v55, 7  ;;  %v429_v4 = vrot.slane %v427_v57, 4  ;;  %v430_v6 = vrot.slane %v427_v57, 3 }
 0x111   :  { %v379_v37 = vsel %vm377_vm14, %v373_v33, %v378_v36  ;;  %v433_v24 = vrot.slane %v427_v57, 5  ;;  %v436_v7 = vrot.slane %v427_v57, 6  ;;  %v439_v53 = vrot.slane %v427_v57, 7 }
 0x112   :  { %v381_v38 = vrot.slane %v379_v37, 7  ;;  %v445_v19 = vsel %vm669_vm1, %v799_v31, %v444_v8  ;;  %v463_v30 = vsel %vm648_vm8, %v799_v31, %v462_v27 }
 0x113   :  { %v447_v22 = vrot.slane %v445_v19, 4  ;;  %v448_v51 = vrot.slane %v445_v19, 3  ;;  %v451_v25 = vrot.slane %v445_v19, 5  ;;  %v454_v26 = vrot.slane %v445_v19, 6 }
 0x114   :  { %v382_v39 = vsel %vm380_vm0, %v373_v33, %v381_v38  ;;  %v457_v20 = vrot.slane %v445_v19, 7  ;;  %v465_v34 = vrot.slane %v463_v30, 4  ;;  %v466_v35 = vrot.slane %v463_v30, 3 }
 0x115   :  { %v384_v40 = vrot.slane %v382_v39, 7  ;;  %v469_v36 = vrot.slane %v463_v30, 5  ;;  %v472_v38 = vrot.slane %v463_v30, 6  ;;  %v480_v39 = vld [vmem:[#allocation2 + $0x30] sm:$0x3f]  ;;  %v475_v41 = vrot.slane %v463_v30, 7 }
 0x117   :  { %v385_v17 = vsel %vm383_vm3, %v373_v33, %v384_v40 }
 0x118   :  { %v387_v42 = vrot.slane %v385_v17, 7 }
 0x11a   :  { %v388_v43 = vsel %vm386_vm2, %v373_v33, %v387_v42  ;;  %vm481_vm2 = vcmp.eq.s32.totalorder %v620_v13, 0 }
 0x11b   :  { %389 = vst [vmem:[#allocation3 + $0x1] sm:$0x20] %v388_v43  ;;  %vm392_vm4 = vcmp.eq.s32.totalorder %v388_v43, 1  ;;  %vm396_vm5 = vcmp.eq.s32.totalorder %v388_v43, 2  ;;  %vm399_vm6 = vcmp.eq.s32.totalorder %v388_v43, 3  ;;  %vm402_vm15 = vcmp.eq.s32.totalorder %v388_v43, 4 }
 0x11c   :  { %v395_v48 = vsel %vm392_vm4, %v393_v44, %v394_v45  ;;  %vm405_vm7 = vcmp.eq.s32.totalorder %v388_v43, 5  ;;  %v482_v18 = vsel %vm481_vm2, 1, %v569_v5 }
 0x11d   :  { %v398_v16 = vsel %vm396_vm5, %v397_v47, %v395_v48  ;;  %v483_v23 = vperm.slane %v482_v18, 0 }
 0x11e   :  { %v401_v56 = vsel %vm399_vm6, %v400_v50, %v398_v16 }
 0x11f   :  { %v404_v12 = vsel %vm402_vm15, %v403_v54, %v401_v56 }
 0x120   :  { %v406_v58 = vsel %vm405_vm7, %v391_v10, %v404_v12 }
 0x121   :  { %407 = vst [vmem:[#allocation3] sm:$0x20] %v406_v58  ;;  %vm410_vm9 = vcmp.eq.s32.totalorder %v406_v58, 1  ;;  %vm414_vm10 = vcmp.eq.s32.totalorder %v406_v58, 2  ;;  %vm417_vm11 = vcmp.eq.s32.totalorder %v406_v58, 3  ;;  %vm420_vm13 = vcmp.eq.s32.totalorder %v406_v58, 4 }
 0x122   :  { %v413_v61 = vsel %vm410_vm9, %v411_v9, %v412_v59  ;;  %vm423_vm14 = vcmp.eq.s32.totalorder %v406_v58, 5 }
 0x123   :  { %v416_v63 = vsel %vm414_vm10, %v415_v60, %v413_v61  ;;  %vm484_vm10 = vcmp.eq.s32.totalorder %v483_v23, 1 }
 0x124   :  { %v419_v1 = vsel %vm417_vm11, %v418_v29, %v416_v63  ;;  %v485_v46 = vsel %vm484_vm10, %v799_v31, %v480_v39 }
 0x125   :  { %v422_v2 = vsel %vm420_vm13, %v421_v0, %v419_v1  ;;  %v487_v43 = vrot.slane %v485_v46, 4  ;;  %v488_v44 = vrot.slane %v485_v46, 3  ;;  %v491_v45 = vrot.slane %v485_v46, 5 }
 0x126   :  { %v424_v3 = vsel %vm423_vm14, %v409_v55, %v422_v2  ;;  %v494_v48 = vrot.slane %v485_v46, 6  ;;  %v497_v50 = vrot.slane %v485_v46, 7 }
 0x127   :  { %vm428_vm0 = vcmp.eq.s32.totalorder %v424_v3, 1  ;;  %vm432_vm3 = vcmp.eq.s32.totalorder %v424_v3, 2  ;;  %425 = vst [vmem:[#allocation3 - $0x1] sm:$0x20] %v424_v3  ;;  %vm435_vm4 = vcmp.eq.s32.totalorder %v424_v3, 3  ;;  %vm438_vm12 = vcmp.eq.s32.totalorder %v424_v3, 4 }
 0x128   :  { %v431_v49 = vsel %vm428_vm0, %v429_v4, %v430_v6  ;;  %vm441_vm5 = vcmp.eq.s32.totalorder %v424_v3, 5 }
 0x129   :  { %v434_v11 = vsel %vm432_vm3, %v433_v24, %v431_v49 }
 0x12a   :  { %v437_v14 = vsel %vm435_vm4, %v436_v7, %v434_v11 }
 0x12b   :  { %v440_v15 = vsel %vm438_vm12, %v439_v53, %v437_v14 }
 0x12c   :  { %v442_v21 = vsel %vm441_vm5, %v427_v57, %v440_v15 }
 0x12d   :  { %vm446_vm6 = vcmp.eq.s32.totalorder %v442_v21, 1  ;;  %vm450_vm15 = vcmp.eq.s32.totalorder %v442_v21, 2  ;;  %443 = vst [vmem:[#allocation3 - $0x2] sm:$0x20] %v442_v21  ;;  %vm453_vm7 = vcmp.eq.s32.totalorder %v442_v21, 3  ;;  %vm456_vm1 = vcmp.eq.s32.totalorder %v442_v21, 4 }
 0x12e   :  { %v449_v13 = vsel %vm446_vm6, %v447_v22, %v448_v51  ;;  %vm459_vm9 = vcmp.eq.s32.totalorder %v442_v21, 5 }
 0x12f   :  { %v452_v28 = vsel %vm450_vm15, %v451_v25, %v449_v13 }
 0x130   :  { %v455_v32 = vsel %vm453_vm7, %v454_v26, %v452_v28 }
 0x131   :  { %v458_v5 = vsel %vm456_vm1, %v457_v20, %v455_v32 }
 0x132   :  { %v460_v33 = vsel %vm459_vm9, %v445_v19, %v458_v5 }
 0x133   :  { %vm464_vm11 = vcmp.eq.s32.totalorder %v460_v33, 1  ;;  %vm468_vm13 = vcmp.eq.s32.totalorder %v460_v33, 2  ;;  %461 = vst [vmem:[#allocation3 - $0x3] sm:$0x20] %v460_v33  ;;  %vm471_vm14 = vcmp.eq.s32.totalorder %v460_v33, 3  ;;  %vm474_vm8 = vcmp.eq.s32.totalorder %v460_v33, 4 }
 0x134   :  { %v467_v37 = vsel %vm464_vm11, %v465_v34, %v466_v35  ;;  %vm477_vm0 = vcmp.eq.s32.totalorder %v460_v33, 5 }
 0x135   :  { %v470_v40 = vsel %vm468_vm13, %v469_v36, %v467_v37 }
 0x136   :  { %v473_v17 = vsel %vm471_vm14, %v472_v38, %v470_v40 }
 0x137   :  { %v476_v10 = vsel %vm474_vm8, %v475_v41, %v473_v17 }
 0x138   :  { %v478_v42 = vsel %vm477_vm0, %v463_v30, %v476_v10 }
 0x139   :  { %vm486_vm3 = vcmp.eq.s32.totalorder %v478_v42, 1  ;;  %vm490_vm2 = vcmp.eq.s32.totalorder %v478_v42, 2  ;;  %479 = vst [vmem:[#allocation3 - $0x4] sm:$0x20] %v478_v42  ;;  %vm493_vm4 = vcmp.eq.s32.totalorder %v478_v42, 3  ;;  %vm496_vm12 = vcmp.eq.s32.totalorder %v478_v42, 4 }
 0x13a   :  { %v489_v47 = vsel %vm486_vm3, %v487_v43, %v488_v44  ;;  %vm499_vm5 = vcmp.eq.s32.totalorder %v478_v42, 5 }
 0x13b   :  { %v492_v31 = vsel %vm490_vm2, %v491_v45, %v489_v47 }
 0x13c   :  { %v495_v52 = vsel %vm493_vm4, %v494_v48, %v492_v31 }
 0x13d   :  { %v498_v16 = vsel %vm496_vm12, %v497_v50, %v495_v52 }
 0x13e   :  { %v500_v54 = vsel %vm499_vm5, %v485_v46, %v498_v16 }
 0x13f   :  { %501 = vst [vmem:[#allocation3 - $0x5] sm:$0x20] %v500_v54 }
 0x140   :  { %512 = dma.vmem_to_hbm [thread:$0]  %s508_s8, 128, %s510_s11, [#allocation4]  }
 0x141   :  { %563 = dma.done.wait [#allocation4], 128  }
 0x142   :  { %564 = vsyncadd [#allocation4], 4294967168 }
 0x143   :  { %517 = vsyncpa [#allocation4], 1 }

</bundles_post_ra>
